<compile_context>
chip_gen: v7x
topology: tpu7x:2x2x1
jax: 0.10.0
libtpu: 0.0.40
codegen_flags: <defaults>
</compile_context>

<pallas_src>
import jax
import jax.numpy as jnp
from jax.experimental import pallas as pl
from jax.experimental.pallas import tpu as pltpu

CH_CNN = 128
CH_FC = 128
KSIZE = 4
SEQ = 8                      # Conv1d(k=4) output length = 5, matching incoming_size
L_OUT = SEQ - KSIZE + 1      # 5
N_CH = 8                     # channels used: 0,1 (conv) and 3..7 (linear); 2 unused
INCOMING = 2 * CH_CNN * L_OUT + 5 * CH_FC   # 1920
EPS = 1e-5


def mcritic_kernel(bnw_ref, bnb_ref, bfc3_ref,            # SMEM scalars, shape (1,)
                   rates_ref, bw_ref, s_ref,              # (B,S), (B,S), (B,5)
                   wc1_ref, bc1_ref, wc2_ref, bc2_ref,    # (4,128), (1,128) x2
                   wfc_ref, bfc_ref,                      # (5,128), (5,128)
                   w1_ref, bfc1_ref, wfc3_ref,            # (1920,128), (1,128), (1,128)
                   out_ref):                              # (B,1)
    B = rates_ref.shape[0]

    bn_w = bnw_ref[0]
    bn_b = bnb_ref[0]

    def batchnorm(v):                   # training-mode BatchNorm1d(1) over (B, S)
        mean = jnp.mean(v, keepdims=True)                 # (1,1)
        var = jnp.mean((v - mean) ** 2, keepdims=True)    # biased variance, (1,1)
        return (v - mean) * jax.lax.rsqrt(var + EPS) * bn_w + bn_b

    rates = batchnorm(rates_ref[...])                     # (B, S)
    bw = batchnorm(bw_ref[...])                           # (B, S)

    # Hoisted broadcasts (no per-iteration broadcast_in_dim in the unrolled loops).
    b1 = jnp.broadcast_to(bc1_ref[...], (B, CH_CNN))
    b2 = jnp.broadcast_to(bc2_ref[...], (B, CH_CNN))
    w1rows = [jnp.broadcast_to(wc1_ref[k:k + 1, :], (B, CH_CNN)) for k in range(KSIZE)]
    w2rows = [jnp.broadcast_to(wc2_ref[k:k + 1, :], (B, CH_CNN)) for k in range(KSIZE)]
    r_cols = [jnp.broadcast_to(rates[:, t:t + 1], (B, CH_CNN)) for t in range(SEQ)]
    bw_cols = [jnp.broadcast_to(bw[:, t:t + 1], (B, CH_CNN)) for t in range(SEQ)]

    # Conv1d(1,128,4) + ReLU branches, one lane-dense (B,128) block per position.
    blocks = []
    for l in range(L_OUT):
        a = b1
        for k in range(KSIZE):
            a = a + r_cols[l + k] * w1rows[k]
        blocks.append(jnp.maximum(a, 0.0))
    for l in range(L_OUT):
        a = b2
        for k in range(KSIZE):
            a = a + bw_cols[l + k] * w2rows[k]
        blocks.append(jnp.maximum(a, 0.0))

    # Five Linear(1,128) + ReLU branches on the last-timestep scalars (B,5).
    s = s_ref[...]
    for j in range(5):
        sj = jnp.broadcast_to(s[:, j:j + 1], (B, CH_FC))
        wj = jnp.broadcast_to(wfc_ref[j:j + 1, :], (B, CH_FC))
        bj = jnp.broadcast_to(bfc_ref[j:j + 1, :], (B, CH_FC))
        blocks.append(jnp.maximum(sj * wj + bj, 0.0))

    # Fused fc1: one (B,1920)@(1920,128) MXU matmul against the pre-concatenated slab.
    xcat = jnp.concatenate(blocks, axis=-1)               # (B, 1920), lane-aligned
    h = jnp.maximum(
        jnp.dot(xcat, w1_ref[...], preferred_element_type=jnp.float32)
        + bfc1_ref[...], 0.0)                             # (B, 128)

    # fc3: N=1 output -> VPU multiply + XLU lane reduce instead of an MXU matmul.
    out_ref[...] = (jnp.sum(h * wfc3_ref[...], axis=-1, keepdims=True)
                    + bfc3_ref[0])                        # (B, 1)


@jax.jit
def mcritic_forward(x, kp):
    B = x.shape[0]
    x = x.astype(jnp.float32)
    # Input re-layout done in the wrapper (no strided NCW slicing inside the kernel).
    rates_raw = x[:, 0, :]                                # (B, S)
    bw_raw = x[:, 1, :]                                   # (B, S)
    s = x[:, 3:3 + 5, -1]                                 # (B, 5) last-timestep scalars

    args = (kp['bn_w'], kp['bn_b'], kp['bfc3'],
            rates_raw, bw_raw, s,
            kp['wc1'], kp['bc1'], kp['wc2'], kp['bc2'],
            kp['wfc'], kp['bfc'],
            kp['w1'], kp['bfc1'], kp['wfc3'])

    smem = pl.BlockSpec(memory_space=pltpu.MemorySpace.SMEM)
    vmem = pl.BlockSpec(memory_space=pltpu.MemorySpace.VMEM)
    in_specs = [smem, smem, smem] + [vmem] * 12

    flops = (2 * B * INCOMING * CH_FC                     # fused fc1 matmul
             + 2 * B * CH_CNN * (2 * L_OUT * KSIZE + 5)   # conv/linear VPU branches
             + 2 * B * CH_FC)                             # fc3 reduce
    bytes_accessed = 4 * (INCOMING * CH_FC                # fc1 slab
                          + 2 * KSIZE * CH_CNN + 2 * CH_CNN
                          + 2 * 5 * CH_FC + CH_FC + CH_FC + 3
                          + B * (2 * SEQ + 5) + B)

    # NOTE: gridless (single TensorCore) is the right call at tiny B; if B grows,
    # add a batch grid with dimension_semantics=("parallel",) and pass BN stats in.
    return pl.pallas_call(
        mcritic_kernel,
        out_shape=jax.ShapeDtypeStruct((B, 1), jnp.float32),
        in_specs=in_specs,
        out_specs=vmem,
        cost_estimate=pl.CostEstimate(flops=flops, transcendentals=2,
                                      bytes_accessed=bytes_accessed),
    )(*args)


def init_params(key):
    """Deterministic parameters in the original torch layouts."""
    ks = jax.random.split(key, 10)

    def unif(k, shape, fan_in):
        bound = 1.0 / jnp.sqrt(jnp.float32(fan_in))
        return jax.random.uniform(k, shape, jnp.float32, -bound, bound)

    return {
        'Wc1': unif(ks[0], (CH_CNN, 1, KSIZE), KSIZE),
        'bc1': unif(ks[1], (CH_CNN,), KSIZE),
        'Wc2': unif(ks[2], (CH_CNN, 1, KSIZE), KSIZE),
        'bc2': unif(ks[3], (CH_CNN,), KSIZE),
        'Wfc': unif(ks[4], (5, CH_FC, 1), 1),             # actor_fc_1..5 weights (out, in)
        'bfc': unif(ks[5], (5, CH_FC), 1),
        'Wfc1': unif(ks[6], (CH_FC, INCOMING), INCOMING),
        'bfc1': unif(ks[7], (CH_FC,), INCOMING),
        'Wfc3': unif(ks[8], (1, CH_FC), CH_FC),
        'bfc3': unif(ks[9], (1,), CH_FC),
        'bn_w': jnp.ones((1,), jnp.float32),              # BatchNorm affine defaults
        'bn_b': jnp.zeros((1,), jnp.float32),
    }


def to_kernel_params(p):
    """Re-lay-out torch parameters for the kernel (lane dim = 128 everywhere)."""
    Wfc1 = p['Wfc1']                                      # (128, 1920)
    n1 = CH_CNN * L_OUT                                   # 640
    # conv sections: torch feature index = c*5 + l; kernel block column = 128*l + c
    slab1 = jnp.transpose(Wfc1[:, :n1].reshape(CH_FC, CH_CNN, L_OUT),
                          (2, 1, 0)).reshape(n1, CH_FC)
    slab2 = jnp.transpose(Wfc1[:, n1:2 * n1].reshape(CH_FC, CH_CNN, L_OUT),
                          (2, 1, 0)).reshape(n1, CH_FC)
    # linear section: torch feature index = 1280 + j*128 + i; kernel column = 1280 + 128*j + i
    slab_fc = jnp.transpose(Wfc1[:, 2 * n1:].reshape(CH_FC, 5, CH_FC),
                            (1, 2, 0)).reshape(5 * CH_FC, CH_FC)
    w1 = jnp.concatenate([slab1, slab2, slab_fc], axis=0)  # (1920, 128)
    return {
        'bn_w': p['bn_w'], 'bn_b': p['bn_b'], 'bfc3': p['bfc3'],
        'wc1': p['Wc1'][:, 0, :].T,                       # (4, 128)
        'bc1': p['bc1'][None, :],                         # (1, 128)
        'wc2': p['Wc2'][:, 0, :].T,
        'bc2': p['bc2'][None, :],
        'wfc': p['Wfc'][:, :, 0],                         # (5, 128)
        'bfc': p['bfc'],                                  # (5, 128)
        'w1': w1,                                         # (1920, 128) fused fc1 slab
        'bfc1': p['bfc1'][None, :],                       # (1, 128)
        'wfc3': p['Wfc3'],                                # (1, 128) row for VPU/XLU fc3
    }


def reference_forward(x, p):
    """Pure-JAX replica of MCritic.forward (training-mode BN) for validation."""
    def bn(v):
        m = v.mean()
        var = ((v - m) ** 2).mean()
        return (v - m) / jnp.sqrt(var + EPS) * p['bn_w'][0] + p['bn_b'][0]

    B = x.shape[0]
    rates = bn(x[:, 0, :])
    bw = bn(x[:, 1, :])

    def conv1d(v, W, b):                                  # W (128,1,4), b (128,)
        cols = [v[:, l:l + KSIZE] @ W[:, 0, :].T + b for l in range(L_OUT)]
        return jnp.stack(cols, axis=-1)                   # (B, 128, 5)

    x1 = jax.nn.relu(conv1d(rates, p['Wc1'], p['bc1'])).reshape(B, -1)
    x2 = jax.nn.relu(conv1d(bw, p['Wc2'], p['bc2'])).reshape(B, -1)
    feats = [x1, x2]
    for j in range(5):
        s = x[:, 3 + j, -1:]                              # (B, 1)
        feats.append(jax.nn.relu(s @ p['Wfc'][j].T + p['bfc'][j]))
    xcat = jnp.concatenate(feats, axis=1)                 # (B, 1920)
    h = jax.nn.relu(xcat @ p['Wfc1'].T + p['bfc1'])
    return h @ p['Wfc3'].T + p['bfc3']                    # (B, 1)


if __name__ == "__main__":
    key = jax.random.PRNGKey(0)
    kx, kparam = jax.random.split(key)

    B = 4
    x = jax.random.normal(kx, (B, N_CH, SEQ), jnp.float32)   # (B, C, S) NCW

    torch_params = init_params(kparam)
    kernel_params = to_kernel_params(torch_params)

    out = jax.block_until_ready(mcritic_forward(x, kernel_params))

    ref = reference_forward(x, torch_params)
    assert out.shape == (B, 1), out.shape
    assert jnp.allclose(out, ref, rtol=1e-4, atol=1e-4), (out, ref)
    print("KERNEL_OK")
</pallas_src>

<mosaic_0001>
module attributes {stable_mosaic.version = 11 : i64} {
  func.func @mcritic_kernel(%arg0: memref<1xf32, #tpu.memory_space<smem>>, %arg1: memref<1xf32, #tpu.memory_space<smem>>, %arg2: memref<1xf32, #tpu.memory_space<smem>>, %arg3: memref<4x8xf32, #tpu.memory_space<vmem>>, %arg4: memref<4x8xf32, #tpu.memory_space<vmem>>, %arg5: memref<4x5xf32, #tpu.memory_space<vmem>>, %arg6: memref<4x128xf32, #tpu.memory_space<vmem>>, %arg7: memref<1x128xf32, #tpu.memory_space<vmem>>, %arg8: memref<4x128xf32, #tpu.memory_space<vmem>>, %arg9: memref<1x128xf32, #tpu.memory_space<vmem>>, %arg10: memref<5x128xf32, #tpu.memory_space<vmem>>, %arg11: memref<5x128xf32, #tpu.memory_space<vmem>>, %arg12: memref<1920x128xf32, #tpu.memory_space<vmem>>, %arg13: memref<1x128xf32, #tpu.memory_space<vmem>>, %arg14: memref<1x128xf32, #tpu.memory_space<vmem>>, %arg15: memref<4x1xf32, #tpu.memory_space<vmem>>) attributes {dimension_semantics = [], scalar_prefetch = 0 : i64, scratch_operands = 0 : i64, tpu.core_type = #tpu.core_type<tc>} {
    %c0 = arith.constant 0 : index
    %0 = memref.load %arg0[%c0] : memref<1xf32, #tpu.memory_space<smem>>
    %c0_0 = arith.constant 0 : index
    %1 = memref.load %arg1[%c0_0] : memref<1xf32, #tpu.memory_space<smem>>
    %c0_1 = arith.constant 0 : index
    %c0_2 = arith.constant 0 : index
    %2 = vector.load %arg3[%c0_1, %c0_2] : memref<4x8xf32, #tpu.memory_space<vmem>>, vector<4x8xf32>
    %3 = vector.shape_cast %2 : vector<4x8xf32> to vector<1x4x8xf32>
    %cst = arith.constant dense<0.000000e+00> : vector<1xf32>
    %4 = vector.multi_reduction <add>, %3, %cst [1, 2] : vector<1x4x8xf32> to vector<1xf32>
    %5 = vector.shape_cast %4 : vector<1xf32> to vector<1x1x1xf32>
    %6 = vector.extract %5[0, 0, 0] : f32 from vector<1x1x1xf32>
    %7 = vector.broadcast %6 : f32 to vector<1x1xf32>
    %cst_3 = arith.constant 3.200000e+01 : f32
    %8 = vector.broadcast %cst_3 : f32 to vector<1x1xf32>
    %9 = arith.divf %7, %8 : vector<1x1xf32>
    %10 = vector.broadcast %9 : vector<1x1xf32> to vector<4x8xf32>
    %11 = arith.subf %2, %10 : vector<4x8xf32>
    %12 = arith.mulf %11, %11 : vector<4x8xf32>
    %13 = vector.shape_cast %12 : vector<4x8xf32> to vector<1x4x8xf32>
    %cst_4 = arith.constant dense<0.000000e+00> : vector<1xf32>
    %14 = vector.multi_reduction <add>, %13, %cst_4 [1, 2] : vector<1x4x8xf32> to vector<1xf32>
    %15 = vector.shape_cast %14 : vector<1xf32> to vector<1x1x1xf32>
    %16 = vector.extract %15[0, 0, 0] : f32 from vector<1x1x1xf32>
    %17 = vector.broadcast %16 : f32 to vector<1x1xf32>
    %cst_5 = arith.constant 3.200000e+01 : f32
    %18 = vector.broadcast %cst_5 : f32 to vector<1x1xf32>
    %19 = arith.divf %17, %18 : vector<1x1xf32>
    %20 = vector.broadcast %9 : vector<1x1xf32> to vector<4x8xf32>
    %21 = arith.subf %2, %20 : vector<4x8xf32>
    %cst_6 = arith.constant 9.99999974E-6 : f32
    %22 = vector.broadcast %cst_6 : f32 to vector<1x1xf32>
    %23 = arith.addf %19, %22 : vector<1x1xf32>
    %24 = math.rsqrt %23 : vector<1x1xf32>
    %25 = vector.broadcast %24 : vector<1x1xf32> to vector<4x8xf32>
    %26 = arith.mulf %21, %25 : vector<4x8xf32>
    %27 = vector.broadcast %0 : f32 to vector<4x8xf32>
    %28 = arith.mulf %26, %27 : vector<4x8xf32>
    %29 = vector.broadcast %1 : f32 to vector<4x8xf32>
    %30 = arith.addf %28, %29 : vector<4x8xf32>
    %c0_7 = arith.constant 0 : index
    %c0_8 = arith.constant 0 : index
    %31 = vector.load %arg4[%c0_7, %c0_8] : memref<4x8xf32, #tpu.memory_space<vmem>>, vector<4x8xf32>
    %32 = vector.shape_cast %31 : vector<4x8xf32> to vector<1x4x8xf32>
    %cst_9 = arith.constant dense<0.000000e+00> : vector<1xf32>
    %33 = vector.multi_reduction <add>, %32, %cst_9 [1, 2] : vector<1x4x8xf32> to vector<1xf32>
    %34 = vector.shape_cast %33 : vector<1xf32> to vector<1x1x1xf32>
    %35 = vector.extract %34[0, 0, 0] : f32 from vector<1x1x1xf32>
    %36 = vector.broadcast %35 : f32 to vector<1x1xf32>
    %cst_10 = arith.constant 3.200000e+01 : f32
    %37 = vector.broadcast %cst_10 : f32 to vector<1x1xf32>
    %38 = arith.divf %36, %37 : vector<1x1xf32>
    %39 = vector.broadcast %38 : vector<1x1xf32> to vector<4x8xf32>
    %40 = arith.subf %31, %39 : vector<4x8xf32>
    %41 = arith.mulf %40, %40 : vector<4x8xf32>
    %42 = vector.shape_cast %41 : vector<4x8xf32> to vector<1x4x8xf32>
    %cst_11 = arith.constant dense<0.000000e+00> : vector<1xf32>
    %43 = vector.multi_reduction <add>, %42, %cst_11 [1, 2] : vector<1x4x8xf32> to vector<1xf32>
    %44 = vector.shape_cast %43 : vector<1xf32> to vector<1x1x1xf32>
    %45 = vector.extract %44[0, 0, 0] : f32 from vector<1x1x1xf32>
    %46 = vector.broadcast %45 : f32 to vector<1x1xf32>
    %cst_12 = arith.constant 3.200000e+01 : f32
    %47 = vector.broadcast %cst_12 : f32 to vector<1x1xf32>
    %48 = arith.divf %46, %47 : vector<1x1xf32>
    %49 = vector.broadcast %38 : vector<1x1xf32> to vector<4x8xf32>
    %50 = arith.subf %31, %49 : vector<4x8xf32>
    %cst_13 = arith.constant 9.99999974E-6 : f32
    %51 = vector.broadcast %cst_13 : f32 to vector<1x1xf32>
    %52 = arith.addf %48, %51 : vector<1x1xf32>
    %53 = math.rsqrt %52 : vector<1x1xf32>
    %54 = vector.broadcast %53 : vector<1x1xf32> to vector<4x8xf32>
    %55 = arith.mulf %50, %54 : vector<4x8xf32>
    %56 = vector.broadcast %0 : f32 to vector<4x8xf32>
    %57 = arith.mulf %55, %56 : vector<4x8xf32>
    %58 = vector.broadcast %1 : f32 to vector<4x8xf32>
    %59 = arith.addf %57, %58 : vector<4x8xf32>
    %c0_14 = arith.constant 0 : index
    %c0_15 = arith.constant 0 : index
    %60 = vector.load %arg7[%c0_14, %c0_15] : memref<1x128xf32, #tpu.memory_space<vmem>>, vector<1x128xf32>
    %61 = vector.shape_cast %60 : vector<1x128xf32> to vector<1x128xf32>
    %62 = vector.broadcast %61 : vector<1x128xf32> to vector<4x128xf32>
    %c0_16 = arith.constant 0 : index
    %c0_17 = arith.constant 0 : index
    %63 = vector.load %arg9[%c0_16, %c0_17] : memref<1x128xf32, #tpu.memory_space<vmem>>, vector<1x128xf32>
    %64 = vector.shape_cast %63 : vector<1x128xf32> to vector<1x128xf32>
    %65 = vector.broadcast %64 : vector<1x128xf32> to vector<4x128xf32>
    %c0_18 = arith.constant 0 : index
    %c0_19 = arith.constant 0 : index
    %66 = vector.load %arg6[%c0_18, %c0_19] : memref<4x128xf32, #tpu.memory_space<vmem>>, vector<1x128xf32>
    %67 = vector.shape_cast %66 : vector<1x128xf32> to vector<1x128xf32>
    %68 = vector.broadcast %67 : vector<1x128xf32> to vector<4x128xf32>
    %c1 = arith.constant 1 : index
    %c0_20 = arith.constant 0 : index
    %69 = vector.load %arg6[%c1, %c0_20] : memref<4x128xf32, #tpu.memory_space<vmem>>, vector<1x128xf32>
    %70 = vector.shape_cast %69 : vector<1x128xf32> to vector<1x128xf32>
    %71 = vector.broadcast %70 : vector<1x128xf32> to vector<4x128xf32>
    %c2 = arith.constant 2 : index
    %c0_21 = arith.constant 0 : index
    %72 = vector.load %arg6[%c2, %c0_21] : memref<4x128xf32, #tpu.memory_space<vmem>>, vector<1x128xf32>
    %73 = vector.shape_cast %72 : vector<1x128xf32> to vector<1x128xf32>
    %74 = vector.broadcast %73 : vector<1x128xf32> to vector<4x128xf32>
    %c3 = arith.constant 3 : index
    %c0_22 = arith.constant 0 : index
    %75 = vector.load %arg6[%c3, %c0_22] : memref<4x128xf32, #tpu.memory_space<vmem>>, vector<1x128xf32>
    %76 = vector.shape_cast %75 : vector<1x128xf32> to vector<1x128xf32>
    %77 = vector.broadcast %76 : vector<1x128xf32> to vector<4x128xf32>
    %c0_23 = arith.constant 0 : index
    %c0_24 = arith.constant 0 : index
    %78 = vector.load %arg8[%c0_23, %c0_24] : memref<4x128xf32, #tpu.memory_space<vmem>>, vector<1x128xf32>
    %79 = vector.shape_cast %78 : vector<1x128xf32> to vector<1x128xf32>
    %80 = vector.broadcast %79 : vector<1x128xf32> to vector<4x128xf32>
    %c1_25 = arith.constant 1 : index
    %c0_26 = arith.constant 0 : index
    %81 = vector.load %arg8[%c1_25, %c0_26] : memref<4x128xf32, #tpu.memory_space<vmem>>, vector<1x128xf32>
    %82 = vector.shape_cast %81 : vector<1x128xf32> to vector<1x128xf32>
    %83 = vector.broadcast %82 : vector<1x128xf32> to vector<4x128xf32>
    %c2_27 = arith.constant 2 : index
    %c0_28 = arith.constant 0 : index
    %84 = vector.load %arg8[%c2_27, %c0_28] : memref<4x128xf32, #tpu.memory_space<vmem>>, vector<1x128xf32>
    %85 = vector.shape_cast %84 : vector<1x128xf32> to vector<1x128xf32>
    %86 = vector.broadcast %85 : vector<1x128xf32> to vector<4x128xf32>
    %c3_29 = arith.constant 3 : index
    %c0_30 = arith.constant 0 : index
    %87 = vector.load %arg8[%c3_29, %c0_30] : memref<4x128xf32, #tpu.memory_space<vmem>>, vector<1x128xf32>
    %88 = vector.shape_cast %87 : vector<1x128xf32> to vector<1x128xf32>
    %89 = vector.broadcast %88 : vector<1x128xf32> to vector<4x128xf32>
    %90 = vector.extract_strided_slice %30 {offsets = [0, 0], sizes = [4, 1], strides = [1, 1]} : vector<4x8xf32> to vector<4x1xf32>
    %91 = vector.shape_cast %90 : vector<4x1xf32> to vector<4x1xf32>
    %92 = vector.broadcast %91 : vector<4x1xf32> to vector<4x128xf32>
    %93 = vector.extract_strided_slice %30 {offsets = [0, 1], sizes = [4, 1], strides = [1, 1]} : vector<4x8xf32> to vector<4x1xf32>
    %94 = vector.shape_cast %93 : vector<4x1xf32> to vector<4x1xf32>
    %95 = vector.broadcast %94 : vector<4x1xf32> to vector<4x128xf32>
    %96 = vector.extract_strided_slice %30 {offsets = [0, 2], sizes = [4, 1], strides = [1, 1]} : vector<4x8xf32> to vector<4x1xf32>
    %97 = vector.shape_cast %96 : vector<4x1xf32> to vector<4x1xf32>
    %98 = vector.broadcast %97 : vector<4x1xf32> to vector<4x128xf32>
    %99 = vector.extract_strided_slice %30 {offsets = [0, 3], sizes = [4, 1], strides = [1, 1]} : vector<4x8xf32> to vector<4x1xf32>
    %100 = vector.shape_cast %99 : vector<4x1xf32> to vector<4x1xf32>
    %101 = vector.broadcast %100 : vector<4x1xf32> to vector<4x128xf32>
    %102 = vector.extract_strided_slice %30 {offsets = [0, 4], sizes = [4, 1], strides = [1, 1]} : vector<4x8xf32> to vector<4x1xf32>
    %103 = vector.shape_cast %102 : vector<4x1xf32> to vector<4x1xf32>
    %104 = vector.broadcast %103 : vector<4x1xf32> to vector<4x128xf32>
    %105 = vector.extract_strided_slice %30 {offsets = [0, 5], sizes = [4, 1], strides = [1, 1]} : vector<4x8xf32> to vector<4x1xf32>
    %106 = vector.shape_cast %105 : vector<4x1xf32> to vector<4x1xf32>
    %107 = vector.broadcast %106 : vector<4x1xf32> to vector<4x128xf32>
    %108 = vector.extract_strided_slice %30 {offsets = [0, 6], sizes = [4, 1], strides = [1, 1]} : vector<4x8xf32> to vector<4x1xf32>
    %109 = vector.shape_cast %108 : vector<4x1xf32> to vector<4x1xf32>
    %110 = vector.broadcast %109 : vector<4x1xf32> to vector<4x128xf32>
    %111 = vector.extract_strided_slice %30 {offsets = [0, 7], sizes = [4, 1], strides = [1, 1]} : vector<4x8xf32> to vector<4x1xf32>
    %112 = vector.shape_cast %111 : vector<4x1xf32> to vector<4x1xf32>
    %113 = vector.broadcast %112 : vector<4x1xf32> to vector<4x128xf32>
    %114 = vector.extract_strided_slice %59 {offsets = [0, 0], sizes = [4, 1], strides = [1, 1]} : vector<4x8xf32> to vector<4x1xf32>
    %115 = vector.shape_cast %114 : vector<4x1xf32> to vector<4x1xf32>
    %116 = vector.broadcast %115 : vector<4x1xf32> to vector<4x128xf32>
    %117 = vector.extract_strided_slice %59 {offsets = [0, 1], sizes = [4, 1], strides = [1, 1]} : vector<4x8xf32> to vector<4x1xf32>
    %118 = vector.shape_cast %117 : vector<4x1xf32> to vector<4x1xf32>
    %119 = vector.broadcast %118 : vector<4x1xf32> to vector<4x128xf32>
    %120 = vector.extract_strided_slice %59 {offsets = [0, 2], sizes = [4, 1], strides = [1, 1]} : vector<4x8xf32> to vector<4x1xf32>
    %121 = vector.shape_cast %120 : vector<4x1xf32> to vector<4x1xf32>
    %122 = vector.broadcast %121 : vector<4x1xf32> to vector<4x128xf32>
    %123 = vector.extract_strided_slice %59 {offsets = [0, 3], sizes = [4, 1], strides = [1, 1]} : vector<4x8xf32> to vector<4x1xf32>
    %124 = vector.shape_cast %123 : vector<4x1xf32> to vector<4x1xf32>
    %125 = vector.broadcast %124 : vector<4x1xf32> to vector<4x128xf32>
    %126 = vector.extract_strided_slice %59 {offsets = [0, 4], sizes = [4, 1], strides = [1, 1]} : vector<4x8xf32> to vector<4x1xf32>
    %127 = vector.shape_cast %126 : vector<4x1xf32> to vector<4x1xf32>
    %128 = vector.broadcast %127 : vector<4x1xf32> to vector<4x128xf32>
    %129 = vector.extract_strided_slice %59 {offsets = [0, 5], sizes = [4, 1], strides = [1, 1]} : vector<4x8xf32> to vector<4x1xf32>
    %130 = vector.shape_cast %129 : vector<4x1xf32> to vector<4x1xf32>
    %131 = vector.broadcast %130 : vector<4x1xf32> to vector<4x128xf32>
    %132 = vector.extract_strided_slice %59 {offsets = [0, 6], sizes = [4, 1], strides = [1, 1]} : vector<4x8xf32> to vector<4x1xf32>
    %133 = vector.shape_cast %132 : vector<4x1xf32> to vector<4x1xf32>
    %134 = vector.broadcast %133 : vector<4x1xf32> to vector<4x128xf32>
    %135 = vector.extract_strided_slice %59 {offsets = [0, 7], sizes = [4, 1], strides = [1, 1]} : vector<4x8xf32> to vector<4x1xf32>
    %136 = vector.shape_cast %135 : vector<4x1xf32> to vector<4x1xf32>
    %137 = vector.broadcast %136 : vector<4x1xf32> to vector<4x128xf32>
    %138 = arith.mulf %92, %68 : vector<4x128xf32>
    %139 = arith.addf %62, %138 : vector<4x128xf32>
    %140 = arith.mulf %95, %71 : vector<4x128xf32>
    %141 = arith.addf %139, %140 : vector<4x128xf32>
    %142 = arith.mulf %98, %74 : vector<4x128xf32>
    %143 = arith.addf %141, %142 : vector<4x128xf32>
    %144 = arith.mulf %101, %77 : vector<4x128xf32>
    %145 = arith.addf %143, %144 : vector<4x128xf32>
    %cst_31 = arith.constant 0.000000e+00 : f32
    %146 = vector.broadcast %cst_31 : f32 to vector<4x128xf32>
    %147 = arith.maximumf %145, %146 : vector<4x128xf32>
    %148 = arith.mulf %95, %68 : vector<4x128xf32>
    %149 = arith.addf %62, %148 : vector<4x128xf32>
    %150 = arith.mulf %98, %71 : vector<4x128xf32>
    %151 = arith.addf %149, %150 : vector<4x128xf32>
    %152 = arith.mulf %101, %74 : vector<4x128xf32>
    %153 = arith.addf %151, %152 : vector<4x128xf32>
    %154 = arith.mulf %104, %77 : vector<4x128xf32>
    %155 = arith.addf %153, %154 : vector<4x128xf32>
    %cst_32 = arith.constant 0.000000e+00 : f32
    %156 = vector.broadcast %cst_32 : f32 to vector<4x128xf32>
    %157 = arith.maximumf %155, %156 : vector<4x128xf32>
    %158 = arith.mulf %98, %68 : vector<4x128xf32>
    %159 = arith.addf %62, %158 : vector<4x128xf32>
    %160 = arith.mulf %101, %71 : vector<4x128xf32>
    %161 = arith.addf %159, %160 : vector<4x128xf32>
    %162 = arith.mulf %104, %74 : vector<4x128xf32>
    %163 = arith.addf %161, %162 : vector<4x128xf32>
    %164 = arith.mulf %107, %77 : vector<4x128xf32>
    %165 = arith.addf %163, %164 : vector<4x128xf32>
    %cst_33 = arith.constant 0.000000e+00 : f32
    %166 = vector.broadcast %cst_33 : f32 to vector<4x128xf32>
    %167 = arith.maximumf %165, %166 : vector<4x128xf32>
    %168 = arith.mulf %101, %68 : vector<4x128xf32>
    %169 = arith.addf %62, %168 : vector<4x128xf32>
    %170 = arith.mulf %104, %71 : vector<4x128xf32>
    %171 = arith.addf %169, %170 : vector<4x128xf32>
    %172 = arith.mulf %107, %74 : vector<4x128xf32>
    %173 = arith.addf %171, %172 : vector<4x128xf32>
    %174 = arith.mulf %110, %77 : vector<4x128xf32>
    %175 = arith.addf %173, %174 : vector<4x128xf32>
    %cst_34 = arith.constant 0.000000e+00 : f32
    %176 = vector.broadcast %cst_34 : f32 to vector<4x128xf32>
    %177 = arith.maximumf %175, %176 : vector<4x128xf32>
    %178 = arith.mulf %104, %68 : vector<4x128xf32>
    %179 = arith.addf %62, %178 : vector<4x128xf32>
    %180 = arith.mulf %107, %71 : vector<4x128xf32>
    %181 = arith.addf %179, %180 : vector<4x128xf32>
    %182 = arith.mulf %110, %74 : vector<4x128xf32>
    %183 = arith.addf %181, %182 : vector<4x128xf32>
    %184 = arith.mulf %113, %77 : vector<4x128xf32>
    %185 = arith.addf %183, %184 : vector<4x128xf32>
    %cst_35 = arith.constant 0.000000e+00 : f32
    %186 = vector.broadcast %cst_35 : f32 to vector<4x128xf32>
    %187 = arith.maximumf %185, %186 : vector<4x128xf32>
    %188 = arith.mulf %116, %80 : vector<4x128xf32>
    %189 = arith.addf %65, %188 : vector<4x128xf32>
    %190 = arith.mulf %119, %83 : vector<4x128xf32>
    %191 = arith.addf %189, %190 : vector<4x128xf32>
    %192 = arith.mulf %122, %86 : vector<4x128xf32>
    %193 = arith.addf %191, %192 : vector<4x128xf32>
    %194 = arith.mulf %125, %89 : vector<4x128xf32>
    %195 = arith.addf %193, %194 : vector<4x128xf32>
    %cst_36 = arith.constant 0.000000e+00 : f32
    %196 = vector.broadcast %cst_36 : f32 to vector<4x128xf32>
    %197 = arith.maximumf %195, %196 : vector<4x128xf32>
    %198 = arith.mulf %119, %80 : vector<4x128xf32>
    %199 = arith.addf %65, %198 : vector<4x128xf32>
    %200 = arith.mulf %122, %83 : vector<4x128xf32>
    %201 = arith.addf %199, %200 : vector<4x128xf32>
    %202 = arith.mulf %125, %86 : vector<4x128xf32>
    %203 = arith.addf %201, %202 : vector<4x128xf32>
    %204 = arith.mulf %128, %89 : vector<4x128xf32>
    %205 = arith.addf %203, %204 : vector<4x128xf32>
    %cst_37 = arith.constant 0.000000e+00 : f32
    %206 = vector.broadcast %cst_37 : f32 to vector<4x128xf32>
    %207 = arith.maximumf %205, %206 : vector<4x128xf32>
    %208 = arith.mulf %122, %80 : vector<4x128xf32>
    %209 = arith.addf %65, %208 : vector<4x128xf32>
    %210 = arith.mulf %125, %83 : vector<4x128xf32>
    %211 = arith.addf %209, %210 : vector<4x128xf32>
    %212 = arith.mulf %128, %86 : vector<4x128xf32>
    %213 = arith.addf %211, %212 : vector<4x128xf32>
    %214 = arith.mulf %131, %89 : vector<4x128xf32>
    %215 = arith.addf %213, %214 : vector<4x128xf32>
    %cst_38 = arith.constant 0.000000e+00 : f32
    %216 = vector.broadcast %cst_38 : f32 to vector<4x128xf32>
    %217 = arith.maximumf %215, %216 : vector<4x128xf32>
    %218 = arith.mulf %125, %80 : vector<4x128xf32>
    %219 = arith.addf %65, %218 : vector<4x128xf32>
    %220 = arith.mulf %128, %83 : vector<4x128xf32>
    %221 = arith.addf %219, %220 : vector<4x128xf32>
    %222 = arith.mulf %131, %86 : vector<4x128xf32>
    %223 = arith.addf %221, %222 : vector<4x128xf32>
    %224 = arith.mulf %134, %89 : vector<4x128xf32>
    %225 = arith.addf %223, %224 : vector<4x128xf32>
    %cst_39 = arith.constant 0.000000e+00 : f32
    %226 = vector.broadcast %cst_39 : f32 to vector<4x128xf32>
    %227 = arith.maximumf %225, %226 : vector<4x128xf32>
    %228 = arith.mulf %128, %80 : vector<4x128xf32>
    %229 = arith.addf %65, %228 : vector<4x128xf32>
    %230 = arith.mulf %131, %83 : vector<4x128xf32>
    %231 = arith.addf %229, %230 : vector<4x128xf32>
    %232 = arith.mulf %134, %86 : vector<4x128xf32>
    %233 = arith.addf %231, %232 : vector<4x128xf32>
    %234 = arith.mulf %137, %89 : vector<4x128xf32>
    %235 = arith.addf %233, %234 : vector<4x128xf32>
    %cst_40 = arith.constant 0.000000e+00 : f32
    %236 = vector.broadcast %cst_40 : f32 to vector<4x128xf32>
    %237 = arith.maximumf %235, %236 : vector<4x128xf32>
    %c0_41 = arith.constant 0 : index
    %c0_42 = arith.constant 0 : index
    %238 = vector.load %arg5[%c0_41, %c0_42] : memref<4x5xf32, #tpu.memory_space<vmem>>, vector<4x5xf32>
    %239 = vector.extract_strided_slice %238 {offsets = [0, 0], sizes = [4, 1], strides = [1, 1]} : vector<4x5xf32> to vector<4x1xf32>
    %240 = vector.shape_cast %239 : vector<4x1xf32> to vector<4x1xf32>
    %241 = vector.broadcast %240 : vector<4x1xf32> to vector<4x128xf32>
    %c0_43 = arith.constant 0 : index
    %c0_44 = arith.constant 0 : index
    %242 = vector.load %arg10[%c0_43, %c0_44] : memref<5x128xf32, #tpu.memory_space<vmem>>, vector<1x128xf32>
    %243 = vector.shape_cast %242 : vector<1x128xf32> to vector<1x128xf32>
    %244 = vector.broadcast %243 : vector<1x128xf32> to vector<4x128xf32>
    %c0_45 = arith.constant 0 : index
    %c0_46 = arith.constant 0 : index
    %245 = vector.load %arg11[%c0_45, %c0_46] : memref<5x128xf32, #tpu.memory_space<vmem>>, vector<1x128xf32>
    %246 = vector.shape_cast %245 : vector<1x128xf32> to vector<1x128xf32>
    %247 = vector.broadcast %246 : vector<1x128xf32> to vector<4x128xf32>
    %248 = arith.mulf %241, %244 : vector<4x128xf32>
    %249 = arith.addf %248, %247 : vector<4x128xf32>
    %cst_47 = arith.constant 0.000000e+00 : f32
    %250 = vector.broadcast %cst_47 : f32 to vector<4x128xf32>
    %251 = arith.maximumf %249, %250 : vector<4x128xf32>
    %252 = vector.extract_strided_slice %238 {offsets = [0, 1], sizes = [4, 1], strides = [1, 1]} : vector<4x5xf32> to vector<4x1xf32>
    %253 = vector.shape_cast %252 : vector<4x1xf32> to vector<4x1xf32>
    %254 = vector.broadcast %253 : vector<4x1xf32> to vector<4x128xf32>
    %c1_48 = arith.constant 1 : index
    %c0_49 = arith.constant 0 : index
    %255 = vector.load %arg10[%c1_48, %c0_49] : memref<5x128xf32, #tpu.memory_space<vmem>>, vector<1x128xf32>
    %256 = vector.shape_cast %255 : vector<1x128xf32> to vector<1x128xf32>
    %257 = vector.broadcast %256 : vector<1x128xf32> to vector<4x128xf32>
    %c1_50 = arith.constant 1 : index
    %c0_51 = arith.constant 0 : index
    %258 = vector.load %arg11[%c1_50, %c0_51] : memref<5x128xf32, #tpu.memory_space<vmem>>, vector<1x128xf32>
    %259 = vector.shape_cast %258 : vector<1x128xf32> to vector<1x128xf32>
    %260 = vector.broadcast %259 : vector<1x128xf32> to vector<4x128xf32>
    %261 = arith.mulf %254, %257 : vector<4x128xf32>
    %262 = arith.addf %261, %260 : vector<4x128xf32>
    %cst_52 = arith.constant 0.000000e+00 : f32
    %263 = vector.broadcast %cst_52 : f32 to vector<4x128xf32>
    %264 = arith.maximumf %262, %263 : vector<4x128xf32>
    %265 = vector.extract_strided_slice %238 {offsets = [0, 2], sizes = [4, 1], strides = [1, 1]} : vector<4x5xf32> to vector<4x1xf32>
    %266 = vector.shape_cast %265 : vector<4x1xf32> to vector<4x1xf32>
    %267 = vector.broadcast %266 : vector<4x1xf32> to vector<4x128xf32>
    %c2_53 = arith.constant 2 : index
    %c0_54 = arith.constant 0 : index
    %268 = vector.load %arg10[%c2_53, %c0_54] : memref<5x128xf32, #tpu.memory_space<vmem>>, vector<1x128xf32>
    %269 = vector.shape_cast %268 : vector<1x128xf32> to vector<1x128xf32>
    %270 = vector.broadcast %269 : vector<1x128xf32> to vector<4x128xf32>
    %c2_55 = arith.constant 2 : index
    %c0_56 = arith.constant 0 : index
    %271 = vector.load %arg11[%c2_55, %c0_56] : memref<5x128xf32, #tpu.memory_space<vmem>>, vector<1x128xf32>
    %272 = vector.shape_cast %271 : vector<1x128xf32> to vector<1x128xf32>
    %273 = vector.broadcast %272 : vector<1x128xf32> to vector<4x128xf32>
    %274 = arith.mulf %267, %270 : vector<4x128xf32>
    %275 = arith.addf %274, %273 : vector<4x128xf32>
    %cst_57 = arith.constant 0.000000e+00 : f32
    %276 = vector.broadcast %cst_57 : f32 to vector<4x128xf32>
    %277 = arith.maximumf %275, %276 : vector<4x128xf32>
    %278 = vector.extract_strided_slice %238 {offsets = [0, 3], sizes = [4, 1], strides = [1, 1]} : vector<4x5xf32> to vector<4x1xf32>
    %279 = vector.shape_cast %278 : vector<4x1xf32> to vector<4x1xf32>
    %280 = vector.broadcast %279 : vector<4x1xf32> to vector<4x128xf32>
    %c3_58 = arith.constant 3 : index
    %c0_59 = arith.constant 0 : index
    %281 = vector.load %arg10[%c3_58, %c0_59] : memref<5x128xf32, #tpu.memory_space<vmem>>, vector<1x128xf32>
    %282 = vector.shape_cast %281 : vector<1x128xf32> to vector<1x128xf32>
    %283 = vector.broadcast %282 : vector<1x128xf32> to vector<4x128xf32>
    %c3_60 = arith.constant 3 : index
    %c0_61 = arith.constant 0 : index
    %284 = vector.load %arg11[%c3_60, %c0_61] : memref<5x128xf32, #tpu.memory_space<vmem>>, vector<1x128xf32>
    %285 = vector.shape_cast %284 : vector<1x128xf32> to vector<1x128xf32>
    %286 = vector.broadcast %285 : vector<1x128xf32> to vector<4x128xf32>
    %287 = arith.mulf %280, %283 : vector<4x128xf32>
    %288 = arith.addf %287, %286 : vector<4x128xf32>
    %cst_62 = arith.constant 0.000000e+00 : f32
    %289 = vector.broadcast %cst_62 : f32 to vector<4x128xf32>
    %290 = arith.maximumf %288, %289 : vector<4x128xf32>
    %291 = vector.extract_strided_slice %238 {offsets = [0, 4], sizes = [4, 1], strides = [1, 1]} : vector<4x5xf32> to vector<4x1xf32>
    %292 = vector.shape_cast %291 : vector<4x1xf32> to vector<4x1xf32>
    %293 = vector.broadcast %292 : vector<4x1xf32> to vector<4x128xf32>
    %c4 = arith.constant 4 : index
    %c0_63 = arith.constant 0 : index
    %294 = vector.load %arg10[%c4, %c0_63] : memref<5x128xf32, #tpu.memory_space<vmem>>, vector<1x128xf32>
    %295 = vector.shape_cast %294 : vector<1x128xf32> to vector<1x128xf32>
    %296 = vector.broadcast %295 : vector<1x128xf32> to vector<4x128xf32>
    %c4_64 = arith.constant 4 : index
    %c0_65 = arith.constant 0 : index
    %297 = vector.load %arg11[%c4_64, %c0_65] : memref<5x128xf32, #tpu.memory_space<vmem>>, vector<1x128xf32>
    %298 = vector.shape_cast %297 : vector<1x128xf32> to vector<1x128xf32>
    %299 = vector.broadcast %298 : vector<1x128xf32> to vector<4x128xf32>
    %300 = arith.mulf %293, %296 : vector<4x128xf32>
    %301 = arith.addf %300, %299 : vector<4x128xf32>
    %cst_66 = arith.constant 0.000000e+00 : f32
    %302 = vector.broadcast %cst_66 : f32 to vector<4x128xf32>
    %303 = arith.maximumf %301, %302 : vector<4x128xf32>
    %304 = tpu.concatenate %147, %157, %167, %177, %187, %197, %207, %217, %227, %237, %251, %264, %277, %290, %303 in 1 : vector<4x128xf32>, vector<4x128xf32>, vector<4x128xf32>, vector<4x128xf32>, vector<4x128xf32>, vector<4x128xf32>, vector<4x128xf32>, vector<4x128xf32>, vector<4x128xf32>, vector<4x128xf32>, vector<4x128xf32>, vector<4x128xf32>, vector<4x128xf32>, vector<4x128xf32>, vector<4x128xf32> -> vector<4x1920xf32>
    %c0_67 = arith.constant 0 : index
    %c0_68 = arith.constant 0 : index
    %305 = vector.load %arg12[%c0_67, %c0_68] : memref<1920x128xf32, #tpu.memory_space<vmem>>, vector<1920x128xf32>
    %cst_69 = arith.constant dense<0.000000e+00> : vector<4x128xf32>
    %306 = tpu.matmul %304, %305, %cst_69 {dimension_numbers = #tpu.dot_dimension_numbers<[1], [0], [0], [1], [0, 0, 1, 1], [], []>} : vector<4x1920xf32>, vector<1920x128xf32>, vector<4x128xf32> -> vector<4x128xf32>
    %c0_70 = arith.constant 0 : index
    %c0_71 = arith.constant 0 : index
    %307 = vector.load %arg13[%c0_70, %c0_71] : memref<1x128xf32, #tpu.memory_space<vmem>>, vector<1x128xf32>
    %308 = vector.broadcast %307 : vector<1x128xf32> to vector<4x128xf32>
    %309 = arith.addf %306, %308 : vector<4x128xf32>
    %cst_72 = arith.constant 0.000000e+00 : f32
    %310 = vector.broadcast %cst_72 : f32 to vector<4x128xf32>
    %311 = arith.maximumf %309, %310 : vector<4x128xf32>
    %c0_73 = arith.constant 0 : index
    %c0_74 = arith.constant 0 : index
    %312 = vector.load %arg14[%c0_73, %c0_74] : memref<1x128xf32, #tpu.memory_space<vmem>>, vector<1x128xf32>
    %313 = vector.broadcast %312 : vector<1x128xf32> to vector<4x128xf32>
    %314 = arith.mulf %311, %313 : vector<4x128xf32>
    %cst_75 = arith.constant dense<0.000000e+00> : vector<4xf32>
    %315 = vector.multi_reduction <add>, %314, %cst_75 [1] : vector<4x128xf32> to vector<4xf32>
    %316 = vector.shape_cast %315 : vector<4xf32> to vector<4x1xf32>
    %c0_76 = arith.constant 0 : index
    %317 = memref.load %arg2[%c0_76] : memref<1xf32, #tpu.memory_space<smem>>
    %318 = vector.broadcast %317 : f32 to vector<4x1xf32>
    %319 = arith.addf %316, %318 : vector<4x1xf32>
    %c0_77 = arith.constant 0 : index
    %c0_78 = arith.constant 0 : index
    %320 = vector.load %arg15[%c0_77, %c0_78] : memref<4x1xf32, #tpu.memory_space<vmem>>, vector<4x1xf32>
    tpu.vector_store %arg15[%c0_77, %c0_78], %319 {strides = array<i32>} : memref<4x1xf32, #tpu.memory_space<vmem>>, vector<4x1xf32>,
    return
  }
}

</mosaic_0001>

<bundles_post_ra>
// kernel: mcritic_forward.1
= control target key start
LH: loop header
LB: loop body
LE: loop exit
PB: predicated region body
PF: predicated region fallthrough
CT: control target
= control target key end

     0   :  { %23 = vsyncpa [#allocation6], 0  ;;  %s1903_s18 = smov [#allocation5]   ;;  %s2238_s0 = inlined_call_operand.<no memory space> [shape: f32[1], index: 0, kind: input, shape index: {}]   ;;  %s2239_s1 = inlined_call_operand.<no memory space> [shape: f32[1], index: 1, kind: input, shape index: {}]   ;;  %s2240_s2 = inlined_call_operand.<no memory space> [shape: f32[1], index: 2, kind: input, shape index: {}]   ;;  %s2241_s3 = inlined_call_operand.vmem [shape: f32[4,8], index: 3, kind: input, shape index: {}]   ;;  %s2242_s4 = inlined_call_operand.vmem [shape: f32[4,8], index: 4, kind: input, shape index: {}]   ;;  %s2243_s5 = inlined_call_operand.vmem [shape: f32[4,5], index: 5, kind: input, shape index: {}]   ;;  %s2244_s6 = inlined_call_operand.vmem [shape: f32[4,128], index: 6, kind: input, shape index: {}]   ;;  %s2245_s7 = inlined_call_operand.vmem [shape: f32[1,128], index: 7, kind: input, shape index: {}]   ;;  %s2246_s8 = inlined_call_operand.vmem [shape: f32[4,128], index: 8, kind: input, shape index: {}]   ;;  %s2247_s9 = inlined_call_operand.vmem [shape: f32[1,128], index: 9, kind: input, shape index: {}]   ;;  %s2248_s10 = inlined_call_operand.vmem [shape: f32[5,128], index: 10, kind: input, shape index: {}]   ;;  %s2249_s11 = inlined_call_operand.vmem [shape: f32[5,128], index: 11, kind: input, shape index: {}]   ;;  %s2250_s12 = inlined_call_operand.hbm [shape: f32[1920,128], index: 12, kind: input, shape index: {}]   ;;  %s2251_s13 = inlined_call_operand.vmem [shape: f32[1,128], index: 13, kind: input, shape index: {}]   ;;  %s2252_s14 = inlined_call_operand.vmem [shape: f32[1,128], index: 14, kind: input, shape index: {}]   ;;  %s2253_s15 = inlined_call_operand.vmem [shape: f32[4,1], index: 15, kind: output, shape index: {}]  }
   0x1   :  { %s53_s19 = sshll.u32 %s1903_s18, 4  ;;  %s1879_s22 = scalar_lea.hbm %s2250_s12, 30720  ;;  %s54_s19 = int_to_ptr.vmem [resolvable:$true] %s53_s19 }
   0x2   :  { %p1880_p0 = scmp.ne.s32.totalorder %s2250_s12, %s1879_s22  ;;  %p1883_p1 = scmp.lt.u32.totalorder %s1879_s22, %s2250_s12 }
   0x4   :  { %p1885_p2 = pnand %p1883_p1, %p1880_p0 }
   0x6   :  { %1888 = shalt.err (!%p1885_p2)
}
   0x7   :  { %s1889_s27 = scalar_lea.vmem %s54_s19, 30720  ;;  %p1894_p4 = scmp.lt.s32.totalorder %s54_s19, %s54_s19 }
   0x8   :  { %p1890_p3 = scmp.ne.s32.totalorder %s54_s19, %s1889_s27  ;;  %p1895_p5 = scmp.lt.s32.totalorder %s1889_s27, %s1889_s27 }
   0xa   :  { %p1896_p6 = por %p1895_p5, %p1894_p4 }
   0xc   :  { %p1897_p7 = pnand %p1896_p6, %p1890_p3 }
   0xe   :  { %1900 = shalt.err (!%p1897_p7)
}
   0xf   :  { %s1904_s28 = smov 128   ;;  %s1905_s29 = smov 8  }
  0x10   :  { %59 = dma.hbm_to_vmem [thread:$0]  %s2250_s12, 30720, %s54_s19, [#allocation6], %s1904_s28, %s1904_s28, %s1905_s29  }
  0x11   :  { %1901 = dma.done.wait [#allocation6], 30720  }
  0x12   :  { %1902 = vsyncadd [#allocation6], 4294936576  ;;  %vm70_vm0 = vcmask 60416   ;;  %v69_v0 = vld [vmem:[%s2241_s3] sm:$0xf]  ;;  %v1906_v16 = vmov 1   ;;  %v101_v53 = vstv %s2238_s0  ;;  %v103_v55 = vstv %s2239_s1 }
  0x13   :  { %v71_v1 = vsel %vm70_vm0, %v69_v0, 0.0  ;;  %v105_v2 = vld [vmem:[%s2242_s4] sm:$0xf]  ;;  %1853 = vset.pattern.permute.xlu0 %v1906_v16  ;;  %v1907_v17 = vmov 0   ;;  %v451_v19 = vld [vmem:[#allocation5 + $0x88] sm:$0xff]  ;;  %v452_v23 = vld [vmem:[#allocation5 + $0x90] sm:$0xff] }
  0x14   :  { %72 = vadd.xlane.f32.xlu0 %v71_v1  ;;  %v106_v3 = vsel %vm70_vm0, %v105_v2, 0.0  ;;  %1854 = vset.pattern.permute.xlu1 %v1907_v17  ;;  %v450_v18 = vld [vmem:[#allocation5 + $0x80] sm:$0xff]  ;;  %v435_v22 = vld [vmem:[#allocation5 + $0x8] sm:$0xff]  ;;  %v453_v24 = vld [vmem:[#allocation5 + $0x98] sm:$0xff]  ;;  %vm1915_vm1 = vmmov 0   ;;  %vm1250_vm2 = vcmask 1043456  }
  0x15   :  { %107 = vadd.xlane.f32.xlu1 %v106_v3  ;;  %v434_v20 = vld [vmem:[#allocation5] sm:$0xff]  ;;  %v1583_v21 = vpack.c.bf16 %v451_v19, %v450_v18  ;;  %v1587_v26 = vpack.c.bf16 %v453_v24, %v452_v23  ;;  %v436_v27 = vld [vmem:[#allocation5 + $0x10] sm:$0xff]  ;;  %v437_v28 = vld [vmem:[#allocation5 + $0x18] sm:$0xff]  ;;  %vm1257_vm3 = vcmask 3072  }
  0x16   :  { %v1585_v25 = vpack.c.bf16 %v435_v22, %v434_v20  ;;  %v1589_v30 = vpack.c.bf16 %v437_v28, %v436_v27  ;;  %v454_v58 = vld [vmem:[#allocation5 + $0xa0] sm:$0xff]  ;;  %v455_v59 = vld [vmem:[#allocation5 + $0xa8] sm:$0xff]  ;;  %v468_v18 = vld [vmem:[#allocation5 + $0x110] sm:$0xff] }
  0x17   :  { %1584 = vmatprep.subr.bf16.mxu0 %v1583_v21  ;;  %v1591_v60 = vpack.c.bf16 %v455_v59, %v454_v58  ;;  %v438_v61 = vld [vmem:[#allocation5 + $0x20] sm:$0xff]  ;;  %v439_v62 = vld [vmem:[#allocation5 + $0x28] sm:$0xff]  ;;  %v469_v19 = vld [vmem:[#allocation5 + $0x118] sm:$0xff] }
  0x18   :  { %1586 = vmatpush3.bf16.msra.mxu0 %v1585_v25  ;;  %v482_v63 = vld [vmem:[#allocation5 + $0x180] sm:$0xff]  ;;  %v1593_v1 = vpack.c.bf16 %v439_v62, %v438_v61  ;;  %v1621_v20 = vpack.c.bf16 %v469_v19, %v468_v18  ;;  %v459_v22 = vld [vmem:[#allocation5 + $0xc8] sm:$0xff]  ;;  %v464_v62 = vld [vmem:[#allocation5 + $0xf0] sm:$0xff] }
  0x19   :  { %1588 = vmatprep.subr.bf16.mxu0 %v1587_v26  ;;  %v466_v3 = vld [vmem:[#allocation5 + $0x100] sm:$0xff]  ;;  %v443_v25 = vld [vmem:[#allocation5 + $0x48] sm:$0xff] }
  0x1a   :  { %v458_v21 = vld [vmem:[#allocation5 + $0xc0] sm:$0xff]  ;;  %v487_v28 = vld [vmem:[#allocation5 + $0x1a8] sm:$0xff] }
  0x1b   :  { %v1599_v23 = vpack.c.bf16 %v459_v22, %v458_v21  ;;  %v442_v24 = vld [vmem:[#allocation5 + $0x40] sm:$0xff]  ;;  %v491_v58 = vld [vmem:[#allocation5 + $0x1c8] sm:$0xff]  ;;  %v496_v22 = vld [vmem:[#allocation5 + $0x1f0] sm:$0xff] }
  0x1c   :  { %1590 = vmatpush3.bf16.msra.mxu0 %v1589_v30  ;;  %v1601_v26 = vpack.c.bf16 %v443_v25, %v442_v24  ;;  %v486_v27 = vld [vmem:[#allocation5 + $0x1a0] sm:$0xff]  ;;  %v475_v61 = vld [vmem:[#allocation5 + $0x148] sm:$0xff]  ;;  %v480_v25 = vld [vmem:[#allocation5 + $0x170] sm:$0xff] }
  0x1d   :  { %1592 = vmatprep.subr.bf16.mxu0 %v1591_v60  ;;  %v470_v30 = vld [vmem:[#allocation5 + $0x120] sm:$0xff]  ;;  %v479_v19 = vld [vmem:[#allocation5 + $0x168] sm:$0xff] }
  0x1e   :  { %v474_v60 = vld [vmem:[#allocation5 + $0x140] sm:$0xff] }
  0x1f   :  { %v478_v18 = vld [vmem:[#allocation5 + $0x160] sm:$0xff] }
  0x20   :  { %1594 = vmatpush3.bf16.msra.mxu0 %v1593_v1  ;;  %v448_v1 = vld [vmem:[#allocation5 + $0x70] sm:$0xff]  ;;  %v1641_v21 = vpack.c.bf16 %v479_v19, %v478_v18 }
  0xa1   :  { %v73_v4 = vpop.xlane.xlu0 %72 }
  0xa2   :  { %v74_v5 = vrot.slane %v73_v4, 4  ;;  %v108_v29 = vpop.xlane.xlu1 %107 }
  0xa3   :  { %v109_v31 = vrot.slane %v108_v29, 4 }
  0xa4   :  { %v75_v6 = vadd.f32 %v74_v5, %v73_v4  ;;  %v467_v4 = vld [vmem:[#allocation5 + $0x108] sm:$0xff] }
  0xa5   :  { %v110_v32 = vadd.f32 %v109_v31, %v108_v29  ;;  %v1617_v5 = vpack.c.bf16 %v467_v4, %v466_v3  ;;  %v1623_v29 = vpack.c.bf16 %v487_v28, %v486_v27  ;;  %v471_v31 = vld [vmem:[#allocation5 + $0x128] sm:$0xff] }
  0xa6   :  { %v76_v7 = vrot.slane %v75_v6, 2 }
  0xa7   :  { %v111_v33 = vrot.slane %v110_v32, 2 }
  0xa8   :  { %v77_v8 = vadd.f32 %v76_v7, %v75_v6  ;;  %v456_v6 = vld [vmem:[#allocation5 + $0xb0] sm:$0xff]  ;;  %v457_v7 = vld [vmem:[#allocation5 + $0xb8] sm:$0xff] }
  0xa9   :  { %v112_v37 = vadd.f32 %v111_v33, %v110_v32  ;;  %v1625_v32 = vpack.c.bf16 %v471_v31, %v470_v30  ;;  %v460_v33 = vld [vmem:[#allocation5 + $0xd0] sm:$0xff]  ;;  %v514_v31 = vld [vmem:[#allocation5 + $0x280] sm:$0xff] }
  0xaa   :  { %v78_v9 = vrot.slane %v77_v8, 1 }
  0xab   :  { %v113_v40 = vrot.slane %v112_v37, 1 }
  0xac   :  { %v79_v10 = vadd.f32 %v78_v9, %v77_v8  ;;  %v1595_v8 = vpack.c.bf16 %v457_v7, %v456_v6  ;;  %v440_v9 = vld [vmem:[#allocation5 + $0x30] sm:$0xff]  ;;  %v493_v6 = vld [vmem:[#allocation5 + $0x1d8] sm:$0xff]  ;;  %v1911_v7 = vmov 5  }
  0xad   :  { %v114_v43 = vadd.f32 %v113_v40, %v112_v37  ;;  %v444_v37 = vld [vmem:[#allocation5 + $0x50] sm:$0xff] }
  0xae   :  { %1831 = vpush %v79_v10  ;;  %v441_v10 = vld [vmem:[#allocation5 + $0x38] sm:$0xff]  ;;  %1596 = vmatprep.subr.bf16.mxu0 %v1595_v8  ;;  %v488_v40 = vld [vmem:[#allocation5 + $0x1b0] sm:$0xff] }
  0xdf   :  { %s1832_s12 = spop %1831 }
  0xe0   :  { %v81_v11 = vstv %s1832_s12 }
  0xe1   :  { %v83_v12 = vmul.f32 0.03125, %v81_v11  ;;  %v1597_v11 = vpack.c.bf16 %v441_v10, %v440_v9  ;;  %v476_v9 = vld [vmem:[#allocation5 + $0x150] sm:$0xff]  ;;  %v477_v10 = vld [vmem:[#allocation5 + $0x158] sm:$0xff] }
  0xe3   :  { %v84_v13 = vsub.f32 %v69_v0, %v83_v12  ;;  %v483_v0 = vld [vmem:[#allocation5 + $0x188] sm:$0xff]  ;;  %v484_v12 = vld [vmem:[#allocation5 + $0x190] sm:$0xff]  ;;  %1598 = vmatpush3.bf16.msra.mxu0 %v1597_v11  ;;  %v1637_v11 = vpack.c.bf16 %v477_v10, %v476_v9  ;;  %v498_v9 = vld [vmem:[#allocation5 + $0x200] sm:$0xff] }
  0xe4   :  { %1600 = vmatprep.subr.bf16.mxu0 %v1599_v23  ;;  %v497_v23 = vld [vmem:[#allocation5 + $0x1f8] sm:$0xff] }
  0xe5   :  { %v85_v14 = vmul.f32 %v84_v13, %v84_v13  ;;  %v1643_v24 = vpack.c.bf16 %v497_v23, %v496_v22 }
  0xe7   :  { %v86_v15 = vsel %vm70_vm0, %v85_v14, 0.0  ;;  %v1908_v14 = vmov 2   ;;  %1602 = vmatpush3.bf16.msra.mxu0 %v1601_v26  ;;  %v481_v26 = vld [vmem:[#allocation5 + $0x178] sm:$0xff] }
  0xe8   :  { %87 = vadd.xlane.f32.xlu0 %v86_v15  ;;  %v1645_v27 = vpack.c.bf16 %v481_v26, %v480_v25 }
 0x175   :  { %v88_v34 = vpop.xlane.xlu0 %87 }
 0x176   :  { %v89_v35 = vrot.slane %v88_v34, 4 }
 0x178   :  { %v90_v36 = vadd.f32 %v89_v35, %v88_v34  ;;  %v461_v34 = vld [vmem:[#allocation5 + $0xd8] sm:$0xff]  ;;  %v1909_v35 = vmov 3  }
 0x17a   :  { %v91_v38 = vrot.slane %v90_v36, 2 }
 0x17c   :  { %v92_v39 = vadd.f32 %v91_v38, %v90_v36  ;;  %v1603_v36 = vpack.c.bf16 %v461_v34, %v460_v33  ;;  %v445_v38 = vld [vmem:[#allocation5 + $0x58] sm:$0xff] }
 0x17e   :  { %v93_v41 = vrot.slane %v92_v39, 1  ;;  %1604 = vmatprep.subr.bf16.mxu0 %v1603_v36 }
 0x180   :  { %v94_v42 = vadd.f32 %v93_v41, %v92_v39  ;;  %v1605_v39 = vpack.c.bf16 %v445_v38, %v444_v37  ;;  %v489_v41 = vld [vmem:[#allocation5 + $0x1b8] sm:$0xff]  ;;  %v1266_v37 = vld [vmem:[%s2244_s6] ss:$0 sm:$0xff] }
 0x181   :  { %v546_v38 = vld [vmem:[#allocation5 + $0x380] sm:$0xff] }
 0x182   :  { %1833 = vpush %v94_v42  ;;  %v1627_v42 = vpack.c.bf16 %v489_v41, %v488_v40  ;;  %1606 = vmatpush3.bf16.msra.mxu0 %v1605_v39  ;;  %v547_v40 = vld [vmem:[#allocation5 + $0x388] sm:$0xff] }
 0x183   :  { %1835 = vpush %v114_v43  ;;  %v472_v43 = vld [vmem:[#allocation5 + $0x130] sm:$0xff] }
 0x1b3   :  { %s1834_s3 = spop %1833 }
 0x1b4   :  { %v96_v44 = vstv %s1834_s3  ;;  %s1836_s4 = spop %1835 }
 0x1b5   :  { %v97_v45 = vmul.f32 0.03125, %v96_v44  ;;  %v116_v46 = vstv %s1836_s4  ;;  %v473_v44 = vld [vmem:[#allocation5 + $0x138] sm:$0xff] }
 0x1b6   :  { %v117_v47 = vmul.f32 0.03125, %v116_v46  ;;  %v462_v46 = vld [vmem:[#allocation5 + $0xe0] sm:$0xff] }
 0x1b7   :  { %v98_v48 = vadd.f32 1e-05, %v97_v45  ;;  %v1629_v45 = vpack.c.bf16 %v473_v44, %v472_v43 }
 0x1b8   :  { %v2020_v49 = vsub.f32 %v105_v2, %v117_v47  ;;  %v1615_v2 = vpack.c.bf16 %v483_v0, %v482_v63  ;;  %v463_v47 = vld [vmem:[#allocation5 + $0xe8] sm:$0xff]  ;;  %v1633_v63 = vpack.c.bf16 %v475_v61, %v474_v60  ;;  %v465_v0 = vld [vmem:[#allocation5 + $0xf8] sm:$0xff] }
 0x1b9   :  { %1875 = vrsqrt.f32 %v98_v48  ;;  %v1607_v48 = vpack.c.bf16 %v463_v47, %v462_v46  ;;  %v1611_v3 = vpack.c.bf16 %v465_v0, %v464_v62  ;;  %v1267_v46 = vld [vmem:[%s2244_s6 + $0x1] ss:$0 sm:$0xff] }
 0x1ba   :  { %v119_v50 = vmul.f32 %v2020_v49, %v2020_v49  ;;  %1616 = vmatprep.subr.bf16.mxu1 %v1615_v2  ;;  %v449_v2 = vld [vmem:[#allocation5 + $0x78] sm:$0xff] }
 0x1bb   :  { %1618 = vmatpush3.bf16.msra.mxu1 %v1617_v5  ;;  %1608 = vmatprep.subr.bf16.mxu0 %v1607_v48  ;;  %v1613_v4 = vpack.c.bf16 %v449_v2, %v448_v1  ;;  %v492_v5 = vld [vmem:[#allocation5 + $0x1d0] sm:$0xff] }
 0x1bc   :  { %v120_v51 = vsel %vm70_vm0, %v119_v50, 0.0  ;;  %v446_v50 = vld [vmem:[#allocation5 + $0x60] sm:$0xff]  ;;  %v1635_v8 = vpack.c.bf16 %v493_v6, %v492_v5 }
 0x1bd   :  { %121 = vadd.xlane.f32.xlu1 %v120_v51  ;;  %v447_v51 = vld [vmem:[#allocation5 + $0x68] sm:$0xff] }
 0x1c3   :  { %v1876_v52 = vpop.eup %1875 }
 0x1c4   :  { %v100_v54 = vmul.f32 %v1876_v52, %v84_v13  ;;  %v485_v13 = vld [vmem:[#allocation5 + $0x198] sm:$0xff]  ;;  %v1910_v52 = vmov 4  }
 0x1c5   :  { %v1619_v15 = vpack.c.bf16 %v485_v13, %v484_v12  ;;  %v494_v12 = vld [vmem:[#allocation5 + $0x1e0] sm:$0xff]  ;;  %v495_v13 = vld [vmem:[#allocation5 + $0x1e8] sm:$0xff] }
 0x1c6   :  { %v102_v56 = vmul.f32 %v101_v53, %v100_v54  ;;  %v1609_v54 = vpack.c.bf16 %v447_v51, %v446_v50  ;;  %v1268_v51 = vld [vmem:[%s2244_s6 + $0x2] ss:$0 sm:$0xff] }
 0x1c7   :  { %1620 = vmatprep.subr.bf16.mxu1 %v1619_v15  ;;  %v1639_v15 = vpack.c.bf16 %v495_v13, %v494_v12  ;;  %v499_v12 = vld [vmem:[#allocation5 + $0x208] sm:$0xff]  ;;  %v516_v13 = vld [vmem:[#allocation5 + $0x290] sm:$0xff] }
 0x1c8   :  { %v2039_v57 = vadd.f32 %v103_v55, %v102_v56  ;;  %1622 = vmatpush3.bf16.msra.mxu1 %v1621_v20  ;;  %v490_v56 = vld [vmem:[#allocation5 + $0x1c0] sm:$0xff]  ;;  %1610 = vmatpush3.bf16.msra.mxu0 %v1609_v54  ;;  %v1912_v20 = vmov 6   ;;  %v1649_v26 = vpack.c.bf16 %v499_v12, %v498_v9  ;;  %v533_v9 = vld [vmem:[#allocation5 + $0x318] sm:$0xff] }
 0x1c9   :  { %1624 = vmatprep.subr.bf16.mxu1 %v1623_v29  ;;  %v1631_v59 = vpack.c.bf16 %v491_v58, %v490_v56  ;;  %1612 = vmatprep.subr.bf16.mxu0 %v1611_v3 }
 0x1ca   :  { %197 = vperm.xlu0 %1853, %v2039_v57  }
 0x1cc   :  { %1626 = vmatpush3.bf16.msra.mxu1 %v1625_v32  ;;  %1614 = vmatpush3.bf16.msra.mxu0 %v1613_v4  ;;  %v515_v32 = vld [vmem:[#allocation5 + $0x288] sm:$0xff] }
 0x1cd   :  { %1628 = vmatprep.subr.bf16.mxu1 %v1627_v42  ;;  %v1647_v34 = vpack.c.bf16 %v515_v32, %v514_v31  ;;  %v1679_v42 = vpack.c.bf16 %v547_v40, %v546_v38  ;;  %v500_v32 = vld [vmem:[#allocation5 + $0x210] sm:$0xff]  ;;  %v518_v38 = vld [vmem:[#allocation5 + $0x2a0] sm:$0xff] }
 0x1ce   :  { %193 = vperm.xlu1 %1854, %v2039_v57   ;;  %1862 = vset.pattern.permute.xlu0 %v1908_v14 }
 0x1cf   :  { %1648 = vmatprep.subr.bf16.mxu0 %v1647_v34 }
 0x1d0   :  { %1630 = vmatpush3.bf16.msra.mxu1 %v1629_v45  ;;  %v1264_v45 = vld [vmem:[%s2245_s7] ss:$0 sm:$0xff] }
 0x1d1   :  { %1632 = vmatprep.subr.bf16.mxu1 %v1631_v59  ;;  %v2070_v59 = vld [vmem:[%s2244_s6 + $0x3] ss:$0 sm:$0xff] }
 0x1d2   :  { %1855 = vset.pattern.permute.xlu1 %v1908_v14 }
 0x1d3   :  { %201 = vperm.xlu1 %1855, %v2039_v57  }
 0x1d4   :  { %1634 = vmatpush3.bf16.msra.mxu1 %v1633_v63 }
 0x1d5   :  { %1636 = vmatprep.subr.bf16.mxu1 %v1635_v8 }
 0x1d7   :  { %1856 = vset.pattern.permute.xlu1 %v1909_v35 }
 0x1d8   :  { %205 = vperm.xlu1 %1856, %v2039_v57   ;;  %1638 = vmatpush3.bf16.msra.mxu1 %v1637_v11 }
 0x1d9   :  { %1640 = vmatprep.subr.bf16.mxu1 %v1639_v15  ;;  %v517_v15 = vld [vmem:[#allocation5 + $0x298] sm:$0xff] }
 0x1dc   :  { %1857 = vset.pattern.permute.xlu1 %v1910_v52  ;;  %1642 = vmatpush3.bf16.msra.mxu1 %v1641_v21 }
 0x1dd   :  { %209 = vperm.xlu1 %1857, %v2039_v57   ;;  %1644 = vmatprep.subr.bf16.mxu1 %v1643_v24 }
 0x1e0   :  { %1646 = vmatpush3.bf16.msra.mxu1 %v1645_v27  ;;  %v1651_v27 = vpack.c.bf16 %v517_v15, %v516_v13 }
 0x1e1   :  { %1858 = vset.pattern.permute.xlu1 %v1911_v7  ;;  %1680 = vmatprep.subr.bf16.mxu1 %v1679_v42 }
 0x1e2   :  { %213 = vperm.xlu1 %1858, %v2039_v57  }
 0x1e6   :  { %1859 = vset.pattern.permute.xlu1 %v1912_v20 }
 0x1e7   :  { %217 = vperm.xlu1 %1859, %v2039_v57  }
 0x1eb   :  { %1860 = vset.pattern.permute.xlu1 %v1907_v17 }
 0x249   :  { %v198_v43 = vpop.permute.xlu0 %197 }
 0x24a   :  { %v122_v28 = vpop.xlane.xlu1 %121  ;;  %v266_v50 = vmul.f32 %v1266_v37, %v198_v43  ;;  %v259_v54 = vmul.f32 %v1267_v46, %v198_v43 }
 0x24b   :  { %v123_v29 = vrot.slane %v122_v28, 4 }
 0x24c   :  { %v267_v63 = vadd.f32 %v1264_v45, %v266_v50  ;;  %v503_v50 = vld [vmem:[#allocation5 + $0x228] sm:$0xff] }
 0x24d   :  { %v124_v30 = vadd.f32 %v123_v29, %v122_v28 }
 0x24e   :  { %v194_v33 = vpop.permute.xlu1 %193 }
 0x24f   :  { %v125_v36 = vrot.slane %v124_v30, 2  ;;  %v257_v39 = vmul.f32 %v1266_v37, %v194_v33  ;;  %v501_v33 = vld [vmem:[#allocation5 + $0x218] sm:$0xff] }
 0x250   :  { %v1653_v43 = vpack.c.bf16 %v501_v33, %v500_v32  ;;  %v506_v33 = vld [vmem:[#allocation5 + $0x240] sm:$0xff] }
 0x251   :  { %v126_v41 = vadd.f32 %v125_v36, %v124_v30  ;;  %v258_v47 = vadd.f32 %v1264_v45, %v257_v39  ;;  %v519_v39 = vld [vmem:[#allocation5 + $0x2a8] sm:$0xff] }
 0x252   :  { %v202_v44 = vpop.permute.xlu1 %201 }
 0x253   :  { %v127_v48 = vrot.slane %v126_v41, 1  ;;  %v268_v58 = vmul.f32 %v1267_v46, %v202_v44  ;;  %v260_v61 = vadd.f32 %v259_v54, %v258_v47  ;;  %v261_v62 = vmul.f32 %v1268_v51, %v202_v44 }
 0x254   :  { %v275_v10 = vmul.f32 %v1266_v37, %v202_v44 }
 0x255   :  { %v128_v56 = vadd.f32 %v127_v48, %v126_v41  ;;  %v269_v2 = vadd.f32 %v268_v58, %v267_v63  ;;  %v262_v3 = vadd.f32 %v261_v62, %v260_v61  ;;  %v502_v48 = vld [vmem:[#allocation5 + $0x220] sm:$0xff]  ;;  %v531_v61 = vld [vmem:[#allocation5 + $0x308] sm:$0xff] }
 0x256   :  { %v276_v28 = vadd.f32 %v1264_v45, %v275_v10 }
 0x257   :  { %v206_v60 = vpop.permute.xlu1 %205  ;;  %1837 = vpush %v128_v56 }
 0x258   :  { %v270_v0 = vmul.f32 %v1268_v51, %v206_v60  ;;  %v263_v1 = vmul.f32 %v2070_v59, %v206_v60  ;;  %v284_v18 = vmul.f32 %v1266_v37, %v206_v60  ;;  %v277_v22 = vmul.f32 %v1267_v46, %v206_v60  ;;  %v530_v60 = vld [vmem:[#allocation5 + $0x300] sm:$0xff] }
 0x25a   :  { %v271_v6 = vadd.f32 %v270_v0, %v269_v2  ;;  %v264_v11 = vadd.f32 %v263_v1, %v262_v3  ;;  %v285_v36 = vadd.f32 %v1264_v45, %v284_v18  ;;  %v1657_v0 = vpack.c.bf16 %v503_v50, %v502_v48  ;;  %v548_v1 = vld [vmem:[#allocation5 + $0x390] sm:$0xff]  ;;  %v549_v2 = vld [vmem:[#allocation5 + $0x398] sm:$0xff] }
 0x25b   :  { %v509_v48 = vld [vmem:[#allocation5 + $0x258] sm:$0xff] }
 0x25c   :  { %v210_v4 = vpop.permute.xlu1 %209  ;;  %v265_v31 = vmax.f32 %v264_v11, 0.0 }
 0x25d   :  { %v293_v5 = vmul.f32 %v1266_v37, %v210_v4  ;;  %v272_v8 = vmul.f32 %v2070_v59, %v210_v4  ;;  %v286_v23 = vmul.f32 %v1267_v46, %v210_v4  ;;  %v279_v29 = vmul.f32 %v1268_v51, %v210_v4 }
 0x25e   :  { %v278_v37 = vadd.f32 %v277_v22, %v276_v28  ;;  %v1681_v4 = vpack.c.bf16 %v531_v61, %v530_v60  ;;  %v534_v28 = vld [vmem:[#allocation5 + $0x320] sm:$0xff]  ;;  %v539_v61 = vld [vmem:[#allocation5 + $0x348] sm:$0xff] }
 0x25f   :  { %v294_v19 = vadd.f32 %v1264_v45, %v293_v5  ;;  %v273_v21 = vadd.f32 %v272_v8, %v271_v6  ;;  %v287_v42 = vadd.f32 %v286_v23, %v285_v36  ;;  %v1683_v6 = vpack.c.bf16 %v549_v2, %v548_v1  ;;  %v532_v8 = vld [vmem:[#allocation5 + $0x310] sm:$0xff]  ;;  %v538_v60 = vld [vmem:[#allocation5 + $0x340] sm:$0xff] }
 0x260   :  { %v280_v47 = vadd.f32 %v279_v29, %v278_v37  ;;  %v510_v2 = vld [vmem:[#allocation5 + $0x260] sm:$0xff] }
 0x261   :  { %v214_v24 = vpop.permute.xlu1 %213  ;;  %v274_v25 = vmax.f32 %v273_v21, 0.0  ;;  %v521_v21 = vld [vmem:[#allocation5 + $0x2b8] sm:$0xff] }
 0x262   :  { %v295_v30 = vmul.f32 %v1267_v46, %v214_v24  ;;  %v288_v34 = vmul.f32 %v1268_v51, %v214_v24  ;;  %v281_v40 = vmul.f32 %v2070_v59, %v214_v24  ;;  %v1655_v46 = vpack.c.bf16 %v519_v39, %v518_v38  ;;  %v504_v24 = vld [vmem:[#allocation5 + $0x230] sm:$0xff]  ;;  %v553_v39 = vld [vmem:[#allocation5 + $0x3b8] sm:$0xff] }
 0x263   :  { %745 = vmatprep.mubr.f32.mxu0 %v274_v25  ;;  %v505_v25 = vld [vmem:[#allocation5 + $0x238] sm:$0xff]  ;;  %v552_v38 = vld [vmem:[#allocation5 + $0x3b0] sm:$0xff] }
 0x264   :  { %v296_v41 = vadd.f32 %v295_v30, %v294_v19  ;;  %746 = vmatmul.mubr.f32.vlgmr.msra.gmra.mrb[0].mxu0 %v265_v31  ;;  %v289_v45 = vadd.f32 %v288_v34, %v287_v42  ;;  %v282_v58 = vadd.f32 %v281_v40, %v280_v47  ;;  %v520_v19 = vld [vmem:[#allocation5 + $0x2b0] sm:$0xff]  ;;  %v522_v30 = vld [vmem:[#allocation5 + $0x2c0] sm:$0xff]  ;;  %v523_v31 = vld [vmem:[#allocation5 + $0x2c8] sm:$0xff]  ;;  %v1691_v37 = vpack.c.bf16 %v553_v39, %v552_v38 }
 0x265   :  { %1650 = vmatpush3.bf16.msra.mxu0 %v1649_v26  ;;  %v1659_v23 = vpack.c.bf16 %v521_v21, %v520_v19  ;;  %v1661_v26 = vpack.c.bf16 %v505_v25, %v504_v24  ;;  %v507_v34 = vld [vmem:[#allocation5 + $0x248] sm:$0xff]  ;;  %v536_v40 = vld [vmem:[#allocation5 + $0x330] sm:$0xff]  ;;  %v513_v19 = vld [vmem:[#allocation5 + $0x278] sm:$0xff] }
 0x266   :  { %v218_v44 = vpop.permute.xlu1 %217  ;;  %1652 = vmatprep.subr.bf16.mxu0 %v1651_v27  ;;  %v283_v5 = vmax.f32 %v282_v58, 0.0  ;;  %v550_v27 = vld [vmem:[#allocation5 + $0x3a0] sm:$0xff]  ;;  %v1665_v36 = vpack.c.bf16 %v507_v34, %v506_v33  ;;  %v524_v42 = vld [vmem:[#allocation5 + $0x2d0] sm:$0xff]  ;;  %v559_v24 = vld [vmem:[#allocation5 + $0x3e8] sm:$0xff] }
 0x267   :  { %v290_v54 = vmul.f32 %v2070_v59, %v218_v44  ;;  %v297_v56 = vmul.f32 %v1268_v51, %v218_v44  ;;  %v1685_v51 = vpack.c.bf16 %v533_v9, %v532_v8  ;;  %v557_v8 = vld [vmem:[#allocation5 + $0x3d8] sm:$0xff]  ;;  %v611_v34 = vld [vmem:[#allocation5 + $0x588] sm:$0xff] }
 0x269   :  { %v2076_v62 = vadd.f32 %v297_v56, %v296_v41  ;;  %v291_v63 = vadd.f32 %v290_v54, %v289_v45  ;;  %1654 = vmatpush3.bf16.msra.mxu0 %v1653_v43  ;;  %v537_v41 = vld [vmem:[#allocation5 + $0x338] sm:$0xff]  ;;  %v554_v54 = vld [vmem:[#allocation5 + $0x3c0] sm:$0xff]  ;;  %v555_v56 = vld [vmem:[#allocation5 + $0x3c8] sm:$0xff]  ;;  %v1913_v45 = vmov 7  }
 0x26a   :  { %1656 = vmatprep.subr.bf16.mxu0 %v1655_v46  ;;  %v525_v43 = vld [vmem:[#allocation5 + $0x2d8] sm:$0xff]  ;;  %v1693_v44 = vpack.c.bf16 %v537_v41, %v536_v40  ;;  %v508_v46 = vld [vmem:[#allocation5 + $0x250] sm:$0xff]  ;;  %v1695_v58 = vpack.c.bf16 %v555_v56, %v554_v54 }
 0x26b   :  { %v292_v3 = vmax.f32 %v291_v63, 0.0  ;;  %v1667_v47 = vpack.c.bf16 %v525_v43, %v524_v42  ;;  %v1669_v50 = vpack.c.bf16 %v509_v48, %v508_v46  ;;  %v526_v63 = vld [vmem:[#allocation5 + $0x2e0] sm:$0xff] }
 0x26c   :  { %v2141_v46 = vld [vmem:[%s2246_s8 + $0x3] ss:$0 sm:$0xff] }
 0x26d   :  { %815 = vmatprep.mubr.f32.mxu1 %v292_v3  ;;  %1658 = vmatpush3.bf16.msra.mxu0 %v1657_v0  ;;  %v527_v0 = vld [vmem:[#allocation5 + $0x2e8] sm:$0xff] }
 0x26e   :  { %816 = vmatmul.mubr.f32.vlgmr.msra.gmra.mrb[0].mxu1 %v283_v5  ;;  %1660 = vmatprep.subr.bf16.mxu0 %v1659_v23  ;;  %v1671_v1 = vpack.c.bf16 %v527_v0, %v526_v63  ;;  %v511_v3 = vld [vmem:[#allocation5 + $0x268] sm:$0xff]  ;;  %v558_v23 = vld [vmem:[#allocation5 + $0x3e0] sm:$0xff] }
 0x26f   :  { %1682 = vmatpush3.bf16.msra.mxu1 %v1681_v4  ;;  %v1697_v4 = vpack.c.bf16 %v539_v61, %v538_v60  ;;  %v1673_v5 = vpack.c.bf16 %v511_v3, %v510_v2 }
 0x270   :  { %1684 = vmatprep.subr.bf16.mxu1 %v1683_v6  ;;  %v556_v6 = vld [vmem:[#allocation5 + $0x3d0] sm:$0xff] }
 0x271   :  { %1662 = vmatpush3.bf16.msra.mxu0 %v1661_v26  ;;  %v1699_v9 = vpack.c.bf16 %v557_v8, %v556_v6  ;;  %v1703_v26 = vpack.c.bf16 %v559_v24, %v558_v23  ;;  %v580_v8 = vld [vmem:[#allocation5 + $0x490] sm:$0xff]  ;;  %v565_v23 = vld [vmem:[#allocation5 + $0x418] sm:$0xff] }
 0x273   :  { %1686 = vmatpush3.bf16.msra.mxu1 %v1685_v51  ;;  %v540_v51 = vld [vmem:[#allocation5 + $0x350] sm:$0xff] }
 0x288   :  { %s1838_s6 = spop %1837 }
 0x289   :  { %v130_v10 = vstv %s1838_s6 }
 0x28a   :  { %v131_v11 = vmul.f32 0.03125, %v130_v10  ;;  %v541_v10 = vld [vmem:[#allocation5 + $0x358] sm:$0xff] }
 0x28b   :  { %v1701_v21 = vpack.c.bf16 %v541_v10, %v540_v51 }
 0x28c   :  { %v132_v12 = vadd.f32 1e-05, %v131_v11  ;;  %v347_v11 = vld [vmem:[%s2243_s5] sm:$0xf] }
 0x28e   :  { %1877 = vrsqrt.f32 %v132_v12  ;;  %v528_v12 = vld [vmem:[#allocation5 + $0x2f0] sm:$0xff] }
 0x298   :  { %v1878_v13 = vpop.eup %1877 }
 0x299   :  { %v134_v15 = vmul.f32 %v1878_v13, %v2020_v49  ;;  %v551_v49 = vld [vmem:[#allocation5 + $0x3a8] sm:$0xff]  ;;  %v529_v13 = vld [vmem:[#allocation5 + $0x2f8] sm:$0xff] }
 0x29a   :  { %v1687_v29 = vpack.c.bf16 %v551_v49, %v550_v27  ;;  %v542_v27 = vld [vmem:[#allocation5 + $0x360] sm:$0xff]  ;;  %v543_v49 = vld [vmem:[#allocation5 + $0x368] sm:$0xff] }
 0x29b   :  { %v135_v18 = vmul.f32 %v134_v15, %v101_v53  ;;  %v535_v53 = vld [vmem:[#allocation5 + $0x328] sm:$0xff]  ;;  %v1675_v15 = vpack.c.bf16 %v529_v13, %v528_v12 }
 0x29c   :  { %v1689_v32 = vpack.c.bf16 %v535_v53, %v534_v28  ;;  %1688 = vmatprep.subr.bf16.mxu1 %v1687_v29  ;;  %v579_v28 = vld [vmem:[#allocation5 + $0x488] sm:$0xff]  ;;  %v1705_v53 = vpack.c.bf16 %v543_v49, %v542_v27  ;;  %v560_v29 = vld [vmem:[#allocation5 + $0x3f0] sm:$0xff] }
 0x29d   :  { %v2087_v22 = vadd.f32 %v135_v18, %v103_v55  ;;  %v1663_v55 = vpack.c.bf16 %v523_v31, %v522_v30  ;;  %v512_v18 = vld [vmem:[#allocation5 + $0x270] sm:$0xff]  ;;  %v561_v30 = vld [vmem:[#allocation5 + $0x3f8] sm:$0xff]  ;;  %v583_v27 = vld [vmem:[#allocation5 + $0x4a8] sm:$0xff] }
 0x29e   :  { %1690 = vmatpush3.bf16.msra.mxu1 %v1689_v32  ;;  %v1677_v25 = vpack.c.bf16 %v513_v19, %v512_v18  ;;  %v1707_v31 = vpack.c.bf16 %v561_v30, %v560_v29  ;;  %v544_v32 = vld [vmem:[#allocation5 + $0x370] sm:$0xff] }
 0x29f   :  { %226 = vperm.xlu1 %1860, %v2087_v22   ;;  %234 = vperm.xlu0 %1862, %v2087_v22  }
 0x2a0   :  { %1664 = vmatprep.subr.bf16.mxu0 %v1663_v55  ;;  %1692 = vmatprep.subr.bf16.mxu1 %v1691_v37  ;;  %v545_v55 = vld [vmem:[#allocation5 + $0x378] sm:$0xff] }
 0x2a1   :  { %1666 = vmatpush3.bf16.msra.mxu0 %v1665_v36  ;;  %v1709_v33 = vpack.c.bf16 %v545_v55, %v544_v32 }
 0x2a2   :  { %1694 = vmatpush3.bf16.msra.mxu1 %v1693_v44  ;;  %1668 = vmatprep.subr.bf16.mxu0 %v1667_v47 }
 0x2a3   :  { %1861 = vset.pattern.permute.xlu1 %v1906_v16  ;;  %1865 = vset.pattern.permute.xlu0 %v1910_v52 }
 0x2a4   :  { %230 = vperm.xlu1 %1861, %v2087_v22   ;;  %242 = vperm.xlu0 %1865, %v2087_v22  }
 0x2a5   :  { %1670 = vmatpush3.bf16.msra.mxu0 %v1669_v50  ;;  %1696 = vmatprep.subr.bf16.mxu1 %v1695_v58 }
 0x2a6   :  { %1672 = vmatprep.subr.bf16.mxu0 %v1671_v1  ;;  %1698 = vmatpush3.bf16.msra.mxu1 %v1697_v4  ;;  %v562_v4 = vld [vmem:[#allocation5 + $0x400] sm:$0xff] }
 0x2a7   :  { %1700 = vmatprep.subr.bf16.mxu1 %v1699_v9  ;;  %v581_v9 = vld [vmem:[#allocation5 + $0x498] sm:$0xff] }
 0x2a8   :  { %1863 = vset.pattern.permute.xlu1 %v1909_v35  ;;  %1868 = vset.pattern.permute.xlu0 %v1913_v45  ;;  %v1715_v19 = vpack.c.bf16 %v581_v9, %v580_v8  ;;  %v598_v9 = vld [vmem:[#allocation5 + $0x520] sm:$0xff] }
 0x2a9   :  { %238 = vperm.xlu1 %1863, %v2087_v22   ;;  %254 = vperm.xlu0 %1868, %v2087_v22  }
 0x2aa   :  { %1674 = vmatpush3.bf16.msra.mxu0 %v1673_v5  ;;  %1702 = vmatpush3.bf16.msra.mxu1 %v1701_v21  ;;  %v563_v5 = vld [vmem:[#allocation5 + $0x408] sm:$0xff]  ;;  %v564_v21 = vld [vmem:[#allocation5 + $0x410] sm:$0xff] }
 0x2ab   :  { %1676 = vmatprep.subr.bf16.mxu0 %v1675_v15  ;;  %1704 = vmatprep.subr.bf16.mxu1 %v1703_v26  ;;  %v1713_v12 = vpack.c.bf16 %v563_v5, %v562_v4  ;;  %v582_v26 = vld [vmem:[#allocation5 + $0x4a0] sm:$0xff]  ;;  %v1717_v29 = vpack.c.bf16 %v565_v23, %v564_v21  ;;  %v587_v5 = vld [vmem:[#allocation5 + $0x4c8] sm:$0xff] }
 0x2ac   :  { %v586_v4 = vld [vmem:[#allocation5 + $0x4c0] sm:$0xff] }
 0x2ad   :  { %1864 = vset.pattern.permute.xlu1 %v1913_v45  ;;  %1871 = vset.pattern.permute.xlu0 %v1909_v35  ;;  %v578_v35 = vld [vmem:[#allocation5 + $0x480] sm:$0xff]  ;;  %v1727_v21 = vpack.c.bf16 %v587_v5, %v586_v4  ;;  %v604_v4 = vld [vmem:[#allocation5 + $0x550] sm:$0xff]  ;;  %v605_v5 = vld [vmem:[#allocation5 + $0x558] sm:$0xff] }
 0x2ae   :  { %221 = vperm.xlu1 %1864, %v2039_v57   ;;  %401 = vperm.xlu0 %1871, %v347_v11   ;;  %v1711_v57 = vpack.c.bf16 %v579_v28, %v578_v35  ;;  %v595_v28 = vld [vmem:[#allocation5 + $0x508] sm:$0xff]  ;;  %v570_v23 = vld [vmem:[#allocation5 + $0x440] sm:$0xff] }
 0x2af   :  { %1678 = vmatpush3.bf16.msra.mxu0 %v1677_v25  ;;  %1706 = vmatpush3.bf16.msra.mxu1 %v1705_v53  ;;  %v594_v25 = vld [vmem:[#allocation5 + $0x500] sm:$0xff]  ;;  %v613_v53 = vld [vmem:[#allocation5 + $0x598] sm:$0xff] }
 0x2b0   :  { %1712 = vmatprep.subr.bf16.mxu0 %v1711_v57  ;;  %1708 = vmatprep.subr.bf16.mxu1 %v1707_v31  ;;  %v612_v57 = vld [vmem:[#allocation5 + $0x590] sm:$0xff] }
 0x2b2   :  { %1866 = vset.pattern.permute.xlu1 %v1911_v7  ;;  %1874 = vset.pattern.permute.xlu0 %v1910_v52  ;;  %v610_v7 = vld [vmem:[#allocation5 + $0x580] sm:$0xff] }
 0x2b3   :  { %246 = vperm.xlu1 %1866, %v2087_v22   ;;  %v1743_v36 = vpack.c.bf16 %v611_v34, %v610_v7  ;;  %1710 = vmatpush3.bf16.msra.mxu1 %v1709_v33  ;;  %v1719_v33 = vpack.c.bf16 %v583_v27, %v582_v26  ;;  %v566_v7 = vld [vmem:[#allocation5 + $0x420] sm:$0xff]  ;;  %v567_v34 = vld [vmem:[#allocation5 + $0x428] sm:$0xff]  ;;  %v588_v26 = vld [vmem:[#allocation5 + $0x4d0] sm:$0xff] }
 0x2b4   :  { %v589_v27 = vld [vmem:[#allocation5 + $0x4d8] sm:$0xff] }
 0x2b5   :  { %1744 = vmatprep.subr.bf16.mxu1 %v1743_v36 }
 0x2b7   :  { %1867 = vset.pattern.permute.xlu1 %v1912_v20  ;;  %v2115_v20 = vld [vmem:[%s2246_s8] ss:$0 sm:$0xff] }
 0x2b8   :  { %250 = vperm.xlu1 %1867, %v2087_v22  }
 0x2bc   :  { %1869 = vset.pattern.permute.xlu1 %v1906_v16  ;;  %v2121_v16 = vld [vmem:[%s2247_s9] ss:$0 sm:$0xff] }
 0x2bd   :  { %367 = vperm.xlu1 %1869, %v347_v11  }
 0x2c1   :  { %1870 = vset.pattern.permute.xlu1 %v1907_v17  ;;  %v2126_v17 = vld [vmem:[%s2246_s8 + $0x1] ss:$0 sm:$0xff] }
 0x2c2   :  { %350 = vperm.xlu1 %1870, %v347_v11  }
 0x2c6   :  { %1872 = vset.pattern.permute.xlu1 %v1908_v14  ;;  %v2131_v14 = vld [vmem:[%s2246_s8 + $0x2] ss:$0 sm:$0xff] }
 0x2c7   :  { %384 = vperm.xlu1 %1872, %v347_v11  }
 0x2cb   :  { %1873 = vset.pattern.permute.xlu1 %v1910_v52 }
 0x2cc   :  { %418 = vperm.xlu1 %1873, %v347_v11  }
 0x31e   :  { %v227_v22 = vpop.permute.xlu1 %226  ;;  %v235_v52 = vpop.permute.xlu0 %234 }
 0x31f   :  { %v302_v38 = vmul.f32 %v2115_v20, %v227_v22  ;;  %v306_v42 = vmul.f32 %v2131_v14, %v235_v52  ;;  %v320_v50 = vmul.f32 %v2115_v20, %v235_v52  ;;  %v313_v56 = vmul.f32 %v2126_v17, %v235_v52 }
 0x320   :  { %v1745_v52 = vpack.c.bf16 %v595_v28, %v594_v25 }
 0x321   :  { %v303_v37 = vadd.f32 %v2121_v16, %v302_v38  ;;  %v321_v63 = vadd.f32 %v2121_v16, %v320_v50  ;;  %v597_v50 = vld [vmem:[#allocation5 + $0x518] sm:$0xff] }
 0x323   :  { %v231_v39 = vpop.permute.xlu1 %230  ;;  %v2154_v2 = vpop.permute.xlu0 %242 }
 0x324   :  { %v304_v40 = vmul.f32 %v2126_v17, %v231_v39  ;;  %v311_v41 = vmul.f32 %v2115_v20, %v231_v39  ;;  %v324_v11 = vmul.f32 %v2131_v14, %v2154_v2  ;;  %v317_v13 = vmul.f32 %v2141_v46, %v2154_v2 }
 0x325   :  { %v338_v15 = vmul.f32 %v2115_v20, %v2154_v2  ;;  %v1747_v39 = vpack.c.bf16 %v613_v53, %v612_v57  ;;  %v600_v57 = vld [vmem:[#allocation5 + $0x530] sm:$0xff]  ;;  %v601_v53 = vld [vmem:[#allocation5 + $0x538] sm:$0xff] }
 0x326   :  { %v305_v43 = vadd.f32 %v304_v40, %v303_v37  ;;  %v312_v47 = vadd.f32 %v2121_v16, %v311_v41  ;;  %v584_v37 = vld [vmem:[#allocation5 + $0x4b0] sm:$0xff]  ;;  %v585_v40 = vld [vmem:[#allocation5 + $0x4b8] sm:$0xff] }
 0x327   :  { %v339_v32 = vadd.f32 %v2121_v16, %v338_v15  ;;  %v617_v15 = vld [vmem:[#allocation5 + $0x5b8] sm:$0xff] }
 0x328   :  { %v307_v44 = vadd.f32 %v306_v42, %v305_v43  ;;  %v2143_v48 = vpop.permute.xlu1 %238  ;;  %v314_v60 = vadd.f32 %v313_v56, %v312_v47  ;;  %v255_v31 = vpop.permute.xlu0 %254  ;;  %v596_v47 = vld [vmem:[#allocation5 + $0x510] sm:$0xff]  ;;  %v614_v56 = vld [vmem:[#allocation5 + $0x5a0] sm:$0xff] }
 0x329   :  { %v308_v54 = vmul.f32 %v2141_v46, %v2143_v48  ;;  %v322_v45 = vmul.f32 %v2126_v17, %v2143_v48  ;;  %v315_v61 = vmul.f32 %v2131_v14, %v2143_v48 }
 0x32b   :  { %v309_v58 = vadd.f32 %v308_v54, %v307_v44  ;;  %v323_v6 = vadd.f32 %v322_v45, %v321_v63  ;;  %v316_v51 = vadd.f32 %v315_v61, %v314_v60  ;;  %v1721_v54 = vpack.c.bf16 %v567_v34, %v566_v7  ;;  %v615_v45 = vld [vmem:[#allocation5 + $0x5a8] sm:$0xff]  ;;  %v568_v63 = vld [vmem:[#allocation5 + $0x430] sm:$0xff] }
 0x32c   :  { %v1723_v61 = vpack.c.bf16 %v585_v40, %v584_v37  ;;  %v1751_v8 = vpack.c.bf16 %v615_v45, %v614_v56  ;;  %v590_v37 = vld [vmem:[#allocation5 + $0x4e0] sm:$0xff]  ;;  %v591_v40 = vld [vmem:[#allocation5 + $0x4e8] sm:$0xff] }
 0x32d   :  { %v222_v0 = vpop.permute.xlu1 %221  ;;  %v310_v1 = vmax.f32 %v309_v58, 0.0  ;;  %v318_v35 = vadd.f32 %v317_v13, %v316_v51  ;;  %v344_v58 = vmul.f32 %v2141_v46, %v255_v31  ;;  %v599_v51 = vld [vmem:[#allocation5 + $0x528] sm:$0xff]  ;;  %v616_v13 = vld [vmem:[#allocation5 + $0x5b0] sm:$0xff]  ;;  %v618_v31 = vld [vmem:[#allocation5 + $0x5c0] sm:$0xff] }
 0x32e   :  { %v299_v3 = vmul.f32 %v2070_v59, %v222_v0  ;;  %v569_v0 = vld [vmem:[#allocation5 + $0x438] sm:$0xff]  ;;  %v1753_v25 = vpack.c.bf16 %v599_v51, %v598_v9  ;;  %v1755_v28 = vpack.c.bf16 %v617_v15, %v616_v13  ;;  %v574_v56 = vld [vmem:[#allocation5 + $0x460] sm:$0xff]  ;;  %v575_v45 = vld [vmem:[#allocation5 + $0x468] sm:$0xff] }
 0x32f   :  { %885 = vmatprep.mubr.f32.mxu0 %v310_v1  ;;  %v319_v44 = vmax.f32 %v318_v35, 0.0  ;;  %v1276_v1 = vld [vmem:[%s2248_s10 + $0x1] ss:$0 sm:$0xff]  ;;  %v623_v9 = vld [vmem:[#allocation5 + $0x5e8] sm:$0xff]  ;;  %v576_v13 = vld [vmem:[#allocation5 + $0x470] sm:$0xff] }
 0x330   :  { %v300_v10 = vadd.f32 %v299_v3, %v2076_v62  ;;  %v325_v62 = vadd.f32 %v324_v11, %v323_v6  ;;  %v1749_v3 = vpack.c.bf16 %v597_v50, %v596_v47  ;;  %v603_v47 = vld [vmem:[#allocation5 + $0x548] sm:$0xff] }
 0x332   :  { %v301_v59 = vmax.f32 %v300_v10, 0.0  ;;  %v2164_v18 = vpop.permute.xlu1 %246  ;;  %v1277_v10 = vld [vmem:[%s2249_s11 + $0x1] ss:$0 sm:$0xff] }
 0x333   :  { %v326_v24 = vmul.f32 %v2141_v46, %v2164_v18  ;;  %v340_v49 = vmul.f32 %v2126_v17, %v2164_v18 }
 0x334   :  { %886 = vmatmul.mubr.f32.vlgmr.msra.gmra.mrb[2].mxu0 %v301_v59 }
 0x335   :  { %1714 = vmatpush3.bf16.msra.mxu0 %v1713_v12  ;;  %v327_v30 = vadd.f32 %v326_v24, %v325_v62  ;;  %v341_v41 = vadd.f32 %v340_v49, %v339_v32  ;;  %v1725_v12 = vpack.c.bf16 %v569_v0, %v568_v63  ;;  %v571_v24 = vld [vmem:[#allocation5 + $0x448] sm:$0xff]  ;;  %v1284_v62 = vld [vmem:[%s2251_s13] ss:$0 sm:$0xff]  ;;  %v592_v63 = vld [vmem:[#allocation5 + $0x4f0] sm:$0xff] }
 0x336   :  { %1716 = vmatprep.subr.bf16.mxu0 %v1715_v19  ;;  %v619_v32 = vld [vmem:[#allocation5 + $0x5c8] sm:$0xff]  ;;  %v593_v0 = vld [vmem:[#allocation5 + $0x4f8] sm:$0xff] }
 0x337   :  { %v1318_v55 = vpop.f32.mrb[0].mxu0  ;;  %v2171_v36 = vpop.permute.xlu1 %250  ;;  %v328_v38 = vmax.f32 %v327_v30, 0.0  ;;  %v1729_v30 = vpack.c.bf16 %v571_v24, %v570_v23  ;;  %v607_v23 = vld [vmem:[#allocation5 + $0x568] sm:$0xff] }
 0x338   :  { %v1319_v22 = vpop.f32.mrb[1].mxu0  ;;  %v342_v42 = vmul.f32 %v2131_v14, %v2171_v36 }
 0x339   :  { %v1320_v43 = vadd.f32 %v1319_v22, %v1318_v55  ;;  %1718 = vmatpush3.bf16.msra.mxu0 %v1717_v29  ;;  %955 = vmatprep.mubr.f32.mxu1 %v328_v38  ;;  %v1731_v22 = vpack.c.bf16 %v589_v27, %v588_v26  ;;  %v572_v38 = vld [vmem:[#allocation5 + $0x450] sm:$0xff] }
 0x33a   :  { %v343_v60 = vadd.f32 %v342_v42, %v341_v41  ;;  %956 = vmatmul.mubr.f32.vlgmr.msra.gmra.mrb[2].mxu1 %v319_v44  ;;  %1720 = vmatprep.subr.bf16.mxu0 %v1719_v33  ;;  %v329_v33 = vmul.f32 %v2115_v20, %v2143_v48  ;;  %v1759_v42 = vpack.c.bf16 %v619_v32, %v618_v31  ;;  %v602_v44 = vld [vmem:[#allocation5 + $0x540] sm:$0xff]  ;;  %v620_v20 = vld [vmem:[#allocation5 + $0x5d0] sm:$0xff]  ;;  %v621_v48 = vld [vmem:[#allocation5 + $0x5d8] sm:$0xff] }
 0x33b   :  { %1746 = vmatpush3.bf16.msra.mxu1 %v1745_v52  ;;  %v748_v7 = vadd.f32 %v1320_v43, %v1284_v62  ;;  %v573_v52 = vld [vmem:[#allocation5 + $0x458] sm:$0xff]  ;;  %v624_v62 = vld [vmem:[#allocation5 + $0x5f0] sm:$0xff] }
 0x33c   :  { %1748 = vmatprep.subr.bf16.mxu1 %v1747_v39  ;;  %v345_v6 = vadd.f32 %v344_v58, %v343_v60  ;;  %v368_v11 = vpop.permute.xlu1 %367  ;;  %v1757_v39 = vpack.c.bf16 %v601_v53, %v600_v57  ;;  %v1733_v50 = vpack.c.bf16 %v573_v52, %v572_v38  ;;  %v330_v43 = vadd.f32 %v2121_v16, %v329_v33  ;;  %v1280_v58 = vld [vmem:[%s2248_s10 + $0x3] ss:$0 sm:$0xff]  ;;  %v402_v60 = vpop.permute.xlu0 %401  ;;  %v627_v57 = vld [vmem:[#allocation5 + $0x608] sm:$0xff]  ;;  %v1275_v53 = vld [vmem:[%s2249_s11] ss:$0 sm:$0xff] }
 0x33d   :  { %1722 = vmatpush3.bf16.msra.mxu0 %v1721_v54  ;;  %v380_v59 = vmul.f32 %v1276_v1, %v368_v11  ;;  %v1735_v54 = vpack.c.bf16 %v591_v40, %v590_v37  ;;  %v331_v1 = vmul.f32 %v2126_v17, %v2154_v2  ;;  %v1763_v16 = vpack.c.bf16 %v621_v48, %v620_v20  ;;  %v577_v17 = vld [vmem:[#allocation5 + $0x478] sm:$0xff] }
 0x33e   :  { %1724 = vmatprep.subr.bf16.mxu0 %v1723_v61  ;;  %v346_v19 = vmax.f32 %v345_v6, 0.0  ;;  %v1761_v61 = vpack.c.bf16 %v603_v47, %v602_v44  ;;  %v1737_v6 = vpack.c.bf16 %v575_v45, %v574_v56  ;;  %v414_v51 = vmul.f32 %v1280_v58, %v402_v60  ;;  %v645_v31 = vld [vmem:[#allocation5 + $0x698] sm:$0xff]  ;;  %v647_v44 = vld [vmem:[#allocation5 + $0x6a8] sm:$0xff]  ;;  %v658_v47 = vld [vmem:[#allocation5 + $0x700] sm:$0xff] }
 0x33f   :  { %1750 = vmatpush3.bf16.msra.mxu1 %v1749_v3  ;;  %v381_v49 = vadd.f32 %v1277_v10, %v380_v59  ;;  %v333_v3 = vmul.f32 %v2131_v14, %v2164_v18  ;;  %v332_v10 = vadd.f32 %v331_v1, %v330_v43  ;;  %v335_v11 = vmul.f32 %v2141_v46, %v2171_v36  ;;  %v1281_v14 = vld [vmem:[%s2249_s11 + $0x3] ss:$0 sm:$0xff]  ;;  %v1274_v18 = vld [vmem:[%s2248_s10] ss:$0 sm:$0xff]  ;;  %v609_v33 = vld [vmem:[#allocation5 + $0x578] sm:$0xff] }
 0x340   :  { %1025 = vmatprep.mubr.f32.mxu0 %v346_v19  ;;  %1752 = vmatprep.subr.bf16.mxu1 %v1751_v8  ;;  %v622_v8 = vld [vmem:[#allocation5 + $0x5e0] sm:$0xff]  ;;  %v1765_v2 = vpack.c.bf16 %v605_v5, %v604_v4  ;;  %v643_v19 = vld [vmem:[#allocation5 + $0x688] sm:$0xff]  ;;  %v1741_v24 = vpack.c.bf16 %v577_v17, %v576_v13  ;;  %v415_v26 = vadd.f32 %v1281_v14, %v414_v51  ;;  %v629_v37 = vld [vmem:[#allocation5 + $0x618] sm:$0xff] }
 0x341   :  { %v1353_v35 = vpop.f32.mrb[0].mxu1  ;;  %1726 = vmatpush3.bf16.msra.mxu0 %v1725_v12  ;;  %v382_v55 = vmax.f32 %v381_v49, 0.0  ;;  %v1739_v12 = vpack.c.bf16 %v593_v0, %v592_v63  ;;  %v351_v15 = vpop.permute.xlu1 %350  ;;  %v642_v59 = vld [vmem:[#allocation5 + $0x680] sm:$0xff]  ;;  %v1767_v46 = vpack.c.bf16 %v623_v9, %v622_v8  ;;  %v631_v56 = vld [vmem:[#allocation5 + $0x628] sm:$0xff]  ;;  %v648_v58 = vld [vmem:[#allocation5 + $0x6b0] sm:$0xff]  ;;  %v1916_v9 = vmov 0.0  }
 0x342   :  { %v1354_v29 = vpop.f32.mrb[1].mxu1  ;;  %1728 = vmatprep.subr.bf16.mxu0 %v1727_v21  ;;  %v334_v21 = vadd.f32 %v333_v3, %v332_v10  ;;  %v606_v36 = vld [vmem:[#allocation5 + $0x560] sm:$0xff]  ;;  %v363_v49 = vmul.f32 %v1274_v18, %v351_v15  ;;  %v649_v60 = vld [vmem:[#allocation5 + $0x6b8] sm:$0xff]  ;;  %v660_v63 = vld [vmem:[#allocation5 + $0x710] sm:$0xff] }
 0x343   :  { %v1355_v34 = vadd.f32 %v1354_v29, %v1353_v35  ;;  %1754 = vmatpush3.bf16.msra.mxu1 %v1753_v25  ;;  %1095 = vmatprep.mubr.f32.mxu1 %v382_v55  ;;  %v625_v25 = vld [vmem:[#allocation5 + $0x5f8] sm:$0xff]  ;;  %v1775_v35 = vpack.c.bf16 %v643_v19, %v642_v59  ;;  %v1769_v29 = vpack.c.bf16 %v607_v23, %v606_v36  ;;  %v608_v55 = vld [vmem:[#allocation5 + $0x570] sm:$0xff]  ;;  %v651_v8 = vld [vmem:[#allocation5 + $0x6c8] sm:$0xff] }
 0x344   :  { %1756 = vmatprep.subr.bf16.mxu1 %v1755_v28  ;;  %v336_v27 = vadd.f32 %v335_v11, %v334_v21  ;;  %v626_v28 = vld [vmem:[#allocation5 + $0x600] sm:$0xff]  ;;  %v1771_v32 = vpack.c.bf16 %v625_v25, %v624_v62  ;;  %v364_v38 = vadd.f32 %v1275_v53, %v363_v49  ;;  %v1773_v40 = vpack.c.bf16 %v609_v33, %v608_v55  ;;  %v661_v0 = vld [vmem:[#allocation5 + $0x718] sm:$0xff]  ;;  %v663_v10 = vld [vmem:[#allocation5 + $0x728] sm:$0xff] }
 0x345   :  { %v2187_v41 = vadd.f32 %v1355_v34, %v748_v7  ;;  %1730 = vmatpush3.bf16.msra.mxu0 %v1729_v30  ;;  %v644_v30 = vld [vmem:[#allocation5 + $0x690] sm:$0xff]  ;;  %v1777_v7 = vpack.c.bf16 %v627_v57, %v626_v28  ;;  %v416_v34 = vmax.f32 %v415_v26, 0.0  ;;  %v1787_v3 = vpack.c.bf16 %v649_v60, %v648_v58  ;;  %v633_v4 = vld [vmem:[#allocation5 + $0x638] sm:$0xff]  ;;  %v662_v51 = vld [vmem:[#allocation5 + $0x720] sm:$0xff] }
 0x346   :  { %1732 = vmatprep.subr.bf16.mxu0 %v1731_v22  ;;  %v337_v22 = vmax.f32 %v336_v27, 0.0  ;;  %v1779_v52 = vpack.c.bf16 %v645_v31, %v644_v30  ;;  %v365_v48 = vmax.f32 %v364_v38, 0.0  ;;  %v1811_v5 = vpack.c.bf16 %v661_v0, %v660_v63  ;;  %v634_v13 = vld [vmem:[#allocation5 + $0x640] sm:$0xff]  ;;  %v635_v17 = vld [vmem:[#allocation5 + $0x648] sm:$0xff]  ;;  %v653_v18 = vld [vmem:[#allocation5 + $0x6d8] sm:$0xff] }
 0x347   :  { %1758 = vmatpush3.bf16.msra.mxu1 %v1757_v39  ;;  %v628_v39 = vld [vmem:[#allocation5 + $0x610] sm:$0xff]  ;;  %v1814_v14 = vpack.c.bf16 %v663_v10, %v662_v51  ;;  %v665_v59 = vld [vmem:[#allocation5 + $0x738] sm:$0xff]  ;;  %v1793_v19 = vpack.c.bf16 %v635_v17, %v634_v13  ;;  %v655_v62 = vld [vmem:[#allocation5 + $0x6e8] sm:$0xff] }
 0x348   :  { %1760 = vmatprep.subr.bf16.mxu1 %v1759_v42  ;;  %v646_v42 = vld [vmem:[#allocation5 + $0x6a0] sm:$0xff]  ;;  %v1781_v20 = vpack.c.bf16 %v629_v37, %v628_v39  ;;  %v664_v15 = vld [vmem:[#allocation5 + $0x730] sm:$0xff]  ;;  %v637_v36 = vld [vmem:[#allocation5 + $0x658] sm:$0xff] }
 0x349   :  { %1734 = vmatpush3.bf16.msra.mxu0 %v1733_v50  ;;  %v659_v50 = vld [vmem:[#allocation5 + $0x708] sm:$0xff]  ;;  %v1783_v43 = vpack.c.bf16 %v647_v44, %v646_v42  ;;  %v1817_v23 = vpack.c.bf16 %v665_v59, %v664_v15  ;;  %v666_v25 = vld [vmem:[#allocation5 + $0x740] sm:$0xff]  ;;  %v656_v30 = vld [vmem:[#allocation5 + $0x6f0] sm:$0xff] }
 0x34a   :  { %1736 = vmatprep.subr.bf16.mxu0 %v1735_v54  ;;  %v630_v54 = vld [vmem:[#allocation5 + $0x620] sm:$0xff]  ;;  %v1808_v45 = vpack.c.bf16 %v659_v50, %v658_v47  ;;  %v667_v26 = vld [vmem:[#allocation5 + $0x748] sm:$0xff]  ;;  %v657_v31 = vld [vmem:[#allocation5 + $0x6f8] sm:$0xff] }
 0x34b   :  { %1762 = vmatpush3.bf16.msra.mxu1 %v1761_v61  ;;  %v1914_v61 = vmov 0.0|0.0   ;;  %v1785_v1 = vpack.c.bf16 %v631_v56, %v630_v54  ;;  %v1278_v49 = vld [vmem:[%s2248_s10 + $0x2] ss:$0 sm:$0xff]  ;;  %v639_v53 = vld [vmem:[#allocation5 + $0x668] sm:$0xff]  ;;  %v668_v55 = vld [vmem:[#allocation5 + $0x750] sm:$0xff] }
 0x34c   :  { %1764 = vmatprep.subr.bf16.mxu1 %v1763_v16  ;;  %v632_v16 = vld [vmem:[#allocation5 + $0x630] sm:$0xff]  ;;  %v638_v57 = vld [vmem:[#allocation5 + $0x660] sm:$0xff]  ;;  %v669_v33 = vld [vmem:[#allocation5 + $0x758] sm:$0xff] }
 0x34d   :  { %1738 = vmatpush3.bf16.msra.mxu0 %v1737_v6  ;;  %v650_v6 = vld [vmem:[#allocation5 + $0x6c0] sm:$0xff]  ;;  %v1789_v11 = vpack.c.bf16 %v633_v4, %v632_v16  ;;  %v640_v38 = vld [vmem:[#allocation5 + $0x670] sm:$0xff]  ;;  %v1823_v39 = vpack.c.bf16 %v669_v33, %v668_v55  ;;  %v671_v47 = vld [vmem:[#allocation5 + $0x768] sm:$0xff] }
 0x34e   :  { %1740 = vmatprep.subr.bf16.mxu0 %v1739_v12  ;;  %v1791_v12 = vpack.c.bf16 %v651_v8, %v650_v6  ;;  %v1282_v37 = vld [vmem:[%s2248_s10 + $0x4] ss:$0 sm:$0xff]  ;;  %v672_v56 = vld [vmem:[#allocation5 + $0x770] sm:$0xff] }
 0x34f   :  { %1766 = vmatpush3.bf16.msra.mxu1 %v1765_v2  ;;  %v652_v2 = vld [vmem:[#allocation5 + $0x6d0] sm:$0xff]  ;;  %v670_v44 = vld [vmem:[#allocation5 + $0x760] sm:$0xff] }
 0x350   :  { %1768 = vmatprep.subr.bf16.mxu1 %v1767_v46  ;;  %v1795_v21 = vpack.c.bf16 %v653_v18, %v652_v2  ;;  %v636_v46 = vld [vmem:[#allocation5 + $0x650] sm:$0xff] }
 0x351   :  { %1742 = vmatpush3.bf16.msra.mxu0 %v1741_v24  ;;  %v654_v24 = vld [vmem:[#allocation5 + $0x6e0] sm:$0xff]  ;;  %v1797_v27 = vpack.c.bf16 %v637_v36, %v636_v46 }
 0x352   :  { %1776 = vmatprep.subr.bf16.mxu0 %v1775_v35  ;;  %v385_v35 = vpop.permute.xlu1 %384  ;;  %v1799_v28 = vpack.c.bf16 %v655_v62, %v654_v24  ;;  %v1255_v24 = vstv %s2240_s2 }
 0x353   :  { %1770 = vmatpush3.bf16.msra.mxu1 %v1769_v29  ;;  %v1820_v29 = vpack.c.bf16 %v667_v26, %v666_v25 }
 0x354   :  { %1026 = vmatmul.mubr.f32.vlgmr.msra.gmra.mrb[4].mxu0 %v337_v22  ;;  %1772 = vmatprep.subr.bf16.mxu1 %v1771_v32  ;;  %v397_v32 = vmul.f32 %v1278_v49, %v385_v35  ;;  %v1803_v22 = vpack.c.bf16 %v657_v31, %v656_v30 }
 0x355   :  { %1778 = vmatpush3.bf16.msra.mxu0 %v1777_v7  ;;  %1165 = vmatprep.mubr.f32.mxu0 %v416_v34  ;;  %v1279_v7 = vld [vmem:[%s2249_s11 + $0x2] ss:$0 sm:$0xff]  ;;  %v1801_v34 = vpack.c.bf16 %v639_v53, %v638_v57 }
 0x356   :  { %1780 = vmatprep.subr.bf16.mxu0 %v1779_v52  ;;  %v641_v52 = vld [vmem:[#allocation5 + $0x678] sm:$0xff]  ;;  %v398_v42 = vadd.f32 %v1279_v7, %v397_v32 }
 0x357   :  { %1774 = vmatpush3.bf16.msra.mxu1 %v1773_v40  ;;  %v419_v40 = vpop.permute.xlu1 %418  ;;  %v1805_v50 = vpack.c.bf16 %v641_v52, %v640_v38 }
 0x358   :  { %1807 = vmatprep.subr.bf16.mxu1 %v1914_v61  ;;  %v399_v54 = vmax.f32 %v398_v42, 0.0 }
 0x359   :  { %1782 = vmatpush3.bf16.msra.mxu0 %v1781_v20  ;;  %v431_v20 = vmul.f32 %v1282_v37, %v419_v40 }
 0x35a   :  { %1096 = vmatmul.mubr.f32.vlgmr.msra.gmra.mrb[4].mxu1 %v365_v48  ;;  %1784 = vmatprep.subr.bf16.mxu0 %v1783_v43  ;;  %v1283_v48 = vld [vmem:[%s2249_s11 + $0x4] ss:$0 sm:$0xff]  ;;  %v1826_v43 = vpack.c.bf16 %v671_v47, %v670_v44 }
 0x35b   :  { %1809 = vmatpush3.bf16.msra.mxu1 %v1808_v45  ;;  %1580 = vmatprep.mubr.msk.f32.mxu1 %vm1915_vm1, %v1916_v9  ;;  %v673_v45 = vld [vmem:[#allocation5 + $0x778] sm:$0xff]  ;;  %v432_v58 = vadd.f32 %v1283_v48, %v431_v20 }
 0x35c   :  { %1810 = vmatprep.subr.bf16.mxu1 %v1914_v61  ;;  %v1829_v60 = vpack.c.bf16 %v673_v45, %v672_v56 }
 0x35d   :  { %1786 = vmatpush3.bf16.msra.mxu0 %v1785_v1  ;;  %v433_v63 = vmax.f32 %v432_v58, 0.0 }
 0x35e   :  { %1788 = vmatprep.subr.bf16.mxu0 %v1787_v3 }
 0x35f   :  { %1812 = vmatpush3.bf16.msra.mxu1 %v1811_v5 }
 0x360   :  { %1813 = vmatprep.subr.bf16.mxu1 %v1914_v61 }
 0x361   :  { %1790 = vmatpush3.bf16.msra.mxu0 %v1789_v11 }
 0x362   :  { %1792 = vmatprep.subr.bf16.mxu0 %v1791_v12 }
 0x363   :  { %1815 = vmatpush3.bf16.msra.mxu1 %v1814_v14 }
 0x364   :  { %1816 = vmatprep.subr.bf16.mxu1 %v1914_v61 }
 0x365   :  { %1794 = vmatpush3.bf16.msra.mxu0 %v1793_v19 }
 0x366   :  { %1796 = vmatprep.subr.bf16.mxu0 %v1795_v21 }
 0x367   :  { %1818 = vmatpush3.bf16.msra.mxu1 %v1817_v23 }
 0x368   :  { %1819 = vmatprep.subr.bf16.mxu1 %v1914_v61 }
 0x369   :  { %1798 = vmatpush3.bf16.msra.mxu0 %v1797_v27 }
 0x36a   :  { %1800 = vmatprep.subr.bf16.mxu0 %v1799_v28 }
 0x36b   :  { %1821 = vmatpush3.bf16.msra.mxu1 %v1820_v29 }
 0x36c   :  { %1822 = vmatprep.subr.bf16.mxu1 %v1914_v61 }
 0x36d   :  { %1802 = vmatpush3.bf16.msra.mxu0 %v1801_v34 }
 0x36e   :  { %1804 = vmatprep.subr.bf16.mxu0 %v1803_v22 }
 0x36f   :  { %1824 = vmatpush3.bf16.msra.mxu1 %v1823_v39 }
 0x370   :  { %1825 = vmatprep.subr.bf16.mxu1 %v1914_v61 }
 0x371   :  { %1806 = vmatpush3.bf16.msra.mxu0 %v1805_v50 }
 0x373   :  { %1827 = vmatpush3.bf16.msra.mxu1 %v1826_v43 }
 0x374   :  { %1166 = vmatmul.mubr.f32.vlgmr.msra.gmra.mrb[6].mxu0 %v399_v54  ;;  %1828 = vmatprep.subr.bf16.mxu1 %v1914_v61 }
 0x377   :  { %1830 = vmatpush3.bf16.msra.mxu1 %v1829_v60 }
 0x37a   :  { %1581 = vmatmul.mubr.f32.vlgmr.msra.gmra.mrb[6].mxu1 %v433_v63 }
 0x407   :  { %v1388_v0 = vpop.f32.mrb[2].mxu0 }
 0x408   :  { %v1389_v1 = vpop.f32.mrb[3].mxu0 }
 0x409   :  { %v1390_v3 = vadd.f32 %v1389_v1, %v1388_v0 }
 0x40b   :  { %v888_v16 = vadd.f32 %v1390_v3, %v2187_v41  ;;  %v1285_v41 = vld [vmem:[%s2252_s14] ss:$0 sm:$0xff] }
 0x40d   :  { %v1423_v4 = vpop.f32.mrb[2].mxu1 }
 0x40e   :  { %v1424_v5 = vpop.f32.mrb[3].mxu1 }
 0x40f   :  { %v1425_v6 = vadd.f32 %v1424_v5, %v1423_v4 }
 0x411   :  { %v958_v8 = vadd.f32 %v1425_v6, %v888_v16 }
 0x427   :  { %v1458_v9 = vpop.f32.mrb[4].mxu0 }
 0x428   :  { %v1459_v51 = vpop.f32.mrb[5].mxu0 }
 0x429   :  { %v1460_v10 = vadd.f32 %v1459_v51, %v1458_v9 }
 0x42b   :  { %v1028_v11 = vadd.f32 %v1460_v10, %v958_v8 }
 0x42d   :  { %v1493_v12 = vpop.f32.mrb[4].mxu1 }
 0x42e   :  { %v1494_v13 = vpop.f32.mrb[5].mxu1 }
 0x42f   :  { %v1495_v17 = vadd.f32 %v1494_v13, %v1493_v12 }
 0x431   :  { %v1098_v61 = vadd.f32 %v1495_v17, %v1028_v11 }
 0x447   :  { %v1528_v14 = vpop.f32.mrb[6].mxu0 }
 0x448   :  { %v1529_v2 = vpop.f32.mrb[7].mxu0 }
 0x449   :  { %v1530_v18 = vadd.f32 %v1529_v2, %v1528_v14 }
 0x44b   :  { %v1168_v15 = vadd.f32 %v1530_v18, %v1098_v61 }
 0x44d   :  { %v1237_v59 = vpop.f32.mrb[6].mxu1 }
 0x44e   :  { %v1238_v19 = vadd.f32 %v1237_v59, %v1168_v15  ;;  %v1582_v21 = vpop.f32.mrb[7].mxu1 }
 0x450   :  { %v1241_v46 = vmax.f32 %v1238_v19, 0.0 }
 0x452   :  { %v1249_v36 = vmul.f32 %v1285_v41, %v1241_v46 }
 0x454   :  { %v1251_v23 = vsel %vm1250_vm2, %v1249_v36, 0.0 }
 0x455   :  { %1252 = vadd.xlane.f32.xlu0 %v1251_v23 }
 0x4e2   :  { %v1253_v62 = vpop.xlane.xlu0 %1252 }
 0x4e3   :  { %v1256_v25 = vadd.f32 %v1255_v24, %v1253_v62 }
 0x4e5   :  { %1258 = vst.msk [vmem:[%s2253_s15] sm:$0xf] %vm1257_vm3, %v1256_v25 }
 0x4e6   :  { %1263 = vsyncpa [#allocation6], 1 }

</bundles_post_ra>
